<compile_context>
chip_gen: v7x
topology: tpu7x:2x2x1
jax: 0.10.0
libtpu: 0.0.40
codegen_flags: <defaults>
</compile_context>

<pallas_src>
import functools

import jax
import jax.numpy as jnp
from jax import lax
from jax.experimental import pallas as pl
from jax.experimental.pallas import tpu as pltpu


# ----------------------------------------------------------------------------
# Fused LSTM + output-projection kernel.  Gate order follows PyTorch: i,f,g,o.
# ----------------------------------------------------------------------------
def decoder_kernel(x_ref, wih_ref, whh_ref, bl_ref, wout_ref, bout_ref,
                   out_ref, gx_ref, h_all_ref, *, seq_len, batch):
    # x_ref:     (T*B, E)   time-major flattened input (row = t*B + b)
    # wih_ref:   (E, 4H)    weight_ih_l0.T
    # whh_ref:   (H, 4H)    weight_hh_l0.T
    # bl_ref:    (1, 4H)    bias_ih_l0 + bias_hh_l0
    # wout_ref:  (H, TV)    current vocab tile of the projection weight
    # bout_ref:  (1, TV)
    # out_ref:   (T*B, TV)  logits for this vocab tile
    # gx_ref:    (T*B, 4H)  scratch: hoisted x @ W_ih + b  (persists over grid)
    # h_all_ref: (T*B, H)   scratch: hidden states for all steps (persists)
    H = whh_ref.shape[0]
    B = batch
    T = seq_len

    @pl.when(pl.program_id(0) == 0)
    def _recurrence():
        # One big MXU matmul for the input projection of every time step
        # instead of T tiny (B, E) matmuls inside the loop.
        gx_ref[...] = (
            jnp.dot(x_ref[...], wih_ref[...], preferred_element_type=jnp.float32)
            + bl_ref[...]
        )
        # Hoist the recurrent weight load out of the time loop.
        whh = whh_ref[...]

        def step(t, carry):
            h, c = carry
            row = pl.multiple_of(t * B, B)
            gates = gx_ref[pl.ds(row, B), :] + jnp.dot(
                h, whh, preferred_element_type=jnp.float32)          # (B, 4H)
            i = jax.nn.sigmoid(gates[:, 0 * H:1 * H])
            f = jax.nn.sigmoid(gates[:, 1 * H:2 * H])
            g = jnp.tanh(gates[:, 2 * H:3 * H])
            o = jax.nn.sigmoid(gates[:, 3 * H:4 * H])
            c_new = f * c + i * g
            h_new = o * jnp.tanh(c_new)
            h_all_ref[pl.ds(row, B), :] = h_new
            return h_new, c_new

        h0 = jnp.zeros((B, H), jnp.float32)
        c0 = jnp.zeros((B, H), jnp.float32)
        lax.fori_loop(0, T, step, (h0, c0), unroll=True)

    # Output projection for this vocab tile (runs on every grid step).
    out_ref[...] = (
        jnp.dot(h_all_ref[...], wout_ref[...], preferred_element_type=jnp.float32)
        + bout_ref[...]
    )


def _pick_vocab_tile(v):
    for tv in (1024, 512, 256, 128):
        if v % tv == 0:
            return tv
    return v  # fallback: single full-width tile


# ----------------------------------------------------------------------------
# DecoderRNN forward: JAX glue (embedding gather, concat, pad) + fused kernel.
# ----------------------------------------------------------------------------
def decoder_rnn_forward(params, features, captions):
    # features: (B, E) float32; captions: (B, Tc) int32
    captions = captions[:, :-1]                                # (B, Tc-1)
    emb = jnp.take(params["embed"], captions, axis=0)          # (B, Tc-1, E)
    x = jnp.concatenate([features[:, None, :], emb], axis=1)   # (B, T, E)

    B, T, E = x.shape
    H = params["w_hh"].shape[0]
    V = params["w_out"].shape[1]

    # Pad batch up to a sublane multiple (8): every matmul / store row block
    # becomes sublane-dense.  Padded rows are zeros and are sliced off below.
    Bp = max(8, ((B + 7) // 8) * 8)
    if Bp != B:
        x = jnp.pad(x, ((0, Bp - B), (0, 0), (0, 0)))

    # Time-major flatten so the kernel's sequential loop slices contiguous,
    # sublane-aligned row blocks (no per-step transposes inside the kernel).
    x_flat = jnp.transpose(x, (1, 0, 2)).reshape(T * Bp, E)

    TV = _pick_vocab_tile(V)
    n_v = V // TV

    kernel = functools.partial(decoder_kernel, seq_len=T, batch=Bp)

    logits_flat = pl.pallas_call(
        kernel,
        out_shape=jax.ShapeDtypeStruct((T * Bp, V), jnp.float32),
        grid_spec=pltpu.PrefetchScalarGridSpec(
            num_scalar_prefetch=0,
            grid=(n_v,),
            in_specs=[
                pl.BlockSpec((T * Bp, E), lambda j: (0, 0)),    # x (resident)
                pl.BlockSpec((E, 4 * H), lambda j: (0, 0)),     # W_ih (resident)
                pl.BlockSpec((H, 4 * H), lambda j: (0, 0)),     # W_hh (resident)
                pl.BlockSpec((1, 4 * H), lambda j: (0, 0)),     # lstm bias
                pl.BlockSpec((H, TV), lambda j: (0, j)),        # W_out vocab tile
                pl.BlockSpec((1, TV), lambda j: (0, j)),        # out bias tile
            ],
            out_specs=pl.BlockSpec((T * Bp, TV), lambda j: (0, j)),
            scratch_shapes=[
                pltpu.VMEM((T * Bp, 4 * H), jnp.float32),       # gates_x
                pltpu.VMEM((T * Bp, H), jnp.float32),           # all hidden states
            ],
        ),
        compiler_params=pltpu.CompilerParams(
            # The vocab-tile axis must run sequentially: tile 0 computes the
            # recurrence into scratch that later tiles reuse.
            dimension_semantics=("arbitrary",),
            vmem_limit_bytes=32 * 1024 * 1024,
        ),
    )(x_flat, params["w_ih"], params["w_hh"], params["b_lstm"],
      params["w_out"], params["b_out"])

    # (T*Bp, V) time-major -> (B, T, V) batch-major, dropping batch padding.
    return logits_flat.reshape(T, Bp, V).transpose(1, 0, 2)[:B]


def init_params(key, embed_size, hidden_size, vocab_size):
    ks = jax.random.split(key, 6)
    s = 1.0 / jnp.sqrt(hidden_size)
    return {
        "embed": jax.random.normal(ks[0], (vocab_size, embed_size), jnp.float32),
        # stored pre-transposed: (E, 4H) and (H, 4H); gate order i,f,g,o
        "w_ih": jax.random.uniform(ks[1], (embed_size, 4 * hidden_size),
                                   jnp.float32, -s, s),
        "w_hh": jax.random.uniform(ks[2], (hidden_size, 4 * hidden_size),
                                   jnp.float32, -s, s),
        "b_lstm": jax.random.uniform(ks[3], (1, 4 * hidden_size),
                                     jnp.float32, -s, s),
        "w_out": jax.random.uniform(ks[4], (hidden_size, vocab_size),
                                    jnp.float32, -s, s),
        "b_out": jax.random.uniform(ks[5], (1, vocab_size),
                                    jnp.float32, -s, s),
    }


def reference_forward(params, features, captions):
    """Pure-JAX reference for correctness checking."""
    captions = captions[:, :-1]
    emb = jnp.take(params["embed"], captions, axis=0)
    x = jnp.concatenate([features[:, None, :], emb], axis=1)
    B, T, E = x.shape
    H = params["w_hh"].shape[0]

    def step(carry, x_t):
        h, c = carry
        gates = x_t @ params["w_ih"] + h @ params["w_hh"] + params["b_lstm"]
        i = jax.nn.sigmoid(gates[:, 0 * H:1 * H])
        f = jax.nn.sigmoid(gates[:, 1 * H:2 * H])
        g = jnp.tanh(gates[:, 2 * H:3 * H])
        o = jax.nn.sigmoid(gates[:, 3 * H:4 * H])
        c = f * c + i * g
        h = o * jnp.tanh(c)
        return (h, c), h

    h0 = jnp.zeros((B, H), jnp.float32)
    (_, _), hs = lax.scan(step, (h0, h0), jnp.transpose(x, (1, 0, 2)))
    out = jnp.transpose(hs, (1, 0, 2))                          # (B, T, H)
    return out @ params["w_out"] + params["b_out"]


if __name__ == "__main__":
    # Lane-aligned small sizes: E, H multiples of 128, V multiple of 128.
    embed_size, hidden_size, vocab_size = 128, 128, 256
    B, Tc = 2, 8     # caption length 8 -> LSTM sequence length T = 8

    key = jax.random.PRNGKey(0)
    k_par, k_feat, k_cap = jax.random.split(key, 3)

    params = init_params(k_par, embed_size, hidden_size, vocab_size)
    features = jax.random.normal(k_feat, (B, embed_size), jnp.float32)
    captions = jax.random.randint(k_cap, (B, Tc), 0, vocab_size, jnp.int32)

    fwd = jax.jit(decoder_rnn_forward)
    logits = fwd(params, features, captions)
    jax.block_until_ready(logits)

    ref = reference_forward(params, features, captions)
    assert logits.shape == (B, Tc, vocab_size), logits.shape
    assert jnp.allclose(logits, ref, atol=1e-4, rtol=1e-4), \
        float(jnp.max(jnp.abs(logits - ref)))

    print("KERNEL_OK")
</pallas_src>

<mosaic_0001>
module attributes {stable_mosaic.version = 11 : i64} {
  func.func @decoder_kernel(%arg0: i32, %arg1: memref<64x128xf32, #tpu.memory_space<vmem>>, %arg2: memref<128x512xf32, #tpu.memory_space<vmem>>, %arg3: memref<128x512xf32, #tpu.memory_space<vmem>>, %arg4: memref<1x512xf32, #tpu.memory_space<vmem>>, %arg5: memref<128x256xf32, #tpu.memory_space<vmem>>, %arg6: memref<1x256xf32, #tpu.memory_space<vmem>>, %arg7: memref<64x256xf32, #tpu.memory_space<vmem>>, %arg8: memref<64x512xf32, #tpu.memory_space<vmem>>, %arg9: memref<64x128xf32, #tpu.memory_space<vmem>>) attributes {dimension_semantics = [#tpu.dimension_semantics<arbitrary>], iteration_bounds = array<i64: 1>, scalar_prefetch = 0 : i64, scratch_operands = 2 : i64, tpu.core_type = #tpu.core_type<tc>, window_params = [{pipeline_mode = #tpu.pipeline_mode<synchronous>, transform_indices = @transform_0, window_bounds = array<i64: 64, 128>}, {pipeline_mode = #tpu.pipeline_mode<synchronous>, transform_indices = @transform_1, window_bounds = array<i64: 128, 512>}, {pipeline_mode = #tpu.pipeline_mode<synchronous>, transform_indices = @transform_2, window_bounds = array<i64: 128, 512>}, {pipeline_mode = #tpu.pipeline_mode<synchronous>, transform_indices = @transform_3, window_bounds = array<i64: 1, 512>}, {transform_indices = @transform_4, window_bounds = array<i64: 128, 256>}, {transform_indices = @transform_5, window_bounds = array<i64: 1, 256>}, {transform_indices = @transform_6, window_bounds = array<i64: 64, 256>}]} {
    %c0_i32 = arith.constant 0 : i32
    %0 = arith.cmpi eq, %arg0, %c0_i32 : i32
    %1 = arith.extui %0 : i1 to i32
    %c0_i32_0 = arith.constant 0 : i32
    %2 = arith.cmpi ne, %1, %c0_i32_0 : i32
    scf.if %2 {
      %c0_8 = arith.constant 0 : index
      %c0_9 = arith.constant 0 : index
      %10 = vector.load %arg1[%c0_8, %c0_9] : memref<64x128xf32, #tpu.memory_space<vmem>>, vector<64x128xf32>
      %c0_10 = arith.constant 0 : index
      %c0_11 = arith.constant 0 : index
      %11 = vector.load %arg2[%c0_10, %c0_11] : memref<128x512xf32, #tpu.memory_space<vmem>>, vector<128x512xf32>
      %cst_12 = arith.constant dense<0.000000e+00> : vector<64x512xf32>
      %12 = tpu.matmul %10, %11, %cst_12 {dimension_numbers = #tpu.dot_dimension_numbers<[1], [0], [0], [1], [0, 0, 1, 1], [], []>} : vector<64x128xf32>, vector<128x512xf32>, vector<64x512xf32> -> vector<64x512xf32>
      %c0_13 = arith.constant 0 : index
      %c0_14 = arith.constant 0 : index
      %13 = vector.load %arg4[%c0_13, %c0_14] : memref<1x512xf32, #tpu.memory_space<vmem>>, vector<1x512xf32>
      %14 = vector.broadcast %13 : vector<1x512xf32> to vector<64x512xf32>
      %15 = arith.addf %12, %14 : vector<64x512xf32>
      %c0_15 = arith.constant 0 : index
      %c0_16 = arith.constant 0 : index
      %16 = vector.load %arg8[%c0_15, %c0_16] : memref<64x512xf32, #tpu.memory_space<vmem>>, vector<64x512xf32>
      tpu.vector_store %arg8[%c0_15, %c0_16], %15 {strides = array<i32>} : memref<64x512xf32, #tpu.memory_space<vmem>>, vector<64x512xf32>,
      %c0_17 = arith.constant 0 : index
      %c0_18 = arith.constant 0 : index
      %17 = vector.load %arg3[%c0_17, %c0_18] : memref<128x512xf32, #tpu.memory_space<vmem>>, vector<128x512xf32>
      %cst_19 = arith.constant 0.000000e+00 : f32
      %18 = vector.broadcast %cst_19 : f32 to vector<8x128xf32>
      %cst_20 = arith.constant 0.000000e+00 : f32
      %19 = vector.broadcast %cst_20 : f32 to vector<8x128xf32>
      %c0_i32_21 = arith.constant 0 : i32
      %c8_i32 = arith.constant 8 : i32
      %20 = arith.muli %c0_i32_21, %c8_i32 : i32
      %21 = tpu.assume_multiple %20, 8 : i32
      %22 = arith.index_cast %21 : i32 to index
      %c0_22 = arith.constant 0 : index
      %23 = vector.load %arg8[%22, %c0_22] : memref<64x512xf32, #tpu.memory_space<vmem>>, vector<8x512xf32>
      %cst_23 = arith.constant dense<0.000000e+00> : vector<8x512xf32>
      %24 = tpu.matmul %18, %17, %cst_23 {dimension_numbers = #tpu.dot_dimension_numbers<[1], [0], [0], [1], [0, 0, 1, 1], [], []>} : vector<8x128xf32>, vector<128x512xf32>, vector<8x512xf32> -> vector<8x512xf32>
      %25 = arith.addf %23, %24 : vector<8x512xf32>
      %26 = vector.extract_strided_slice %25 {offsets = [0, 0], sizes = [8, 128], strides = [1, 1]} : vector<8x512xf32> to vector<8x128xf32>
      %27 = arith.negf %26 : vector<8x128xf32>
      %28 = math.exp %27 : vector<8x128xf32>
      %cst_24 = arith.constant 1.000000e+00 : f32
      %29 = vector.broadcast %cst_24 : f32 to vector<8x128xf32>
      %30 = arith.addf %29, %28 : vector<8x128xf32>
      %31 = arith.divf %29, %30 : vector<8x128xf32>
      %32 = vector.extract_strided_slice %25 {offsets = [0, 128], sizes = [8, 128], strides = [1, 1]} : vector<8x512xf32> to vector<8x128xf32>
      %33 = arith.negf %32 : vector<8x128xf32>
      %34 = math.exp %33 : vector<8x128xf32>
      %cst_25 = arith.constant 1.000000e+00 : f32
      %35 = vector.broadcast %cst_25 : f32 to vector<8x128xf32>
      %36 = arith.addf %35, %34 : vector<8x128xf32>
      %37 = arith.divf %35, %36 : vector<8x128xf32>
      %38 = vector.extract_strided_slice %25 {offsets = [0, 256], sizes = [8, 128], strides = [1, 1]} : vector<8x512xf32> to vector<8x128xf32>
      %39 = math.tanh %38 : vector<8x128xf32>
      %40 = vector.extract_strided_slice %25 {offsets = [0, 384], sizes = [8, 128], strides = [1, 1]} : vector<8x512xf32> to vector<8x128xf32>
      %41 = arith.negf %40 : vector<8x128xf32>
      %42 = math.exp %41 : vector<8x128xf32>
      %cst_26 = arith.constant 1.000000e+00 : f32
      %43 = vector.broadcast %cst_26 : f32 to vector<8x128xf32>
      %44 = arith.addf %43, %42 : vector<8x128xf32>
      %45 = arith.divf %43, %44 : vector<8x128xf32>
      %46 = arith.mulf %37, %19 : vector<8x128xf32>
      %47 = arith.mulf %31, %39 : vector<8x128xf32>
      %48 = arith.addf %46, %47 : vector<8x128xf32>
      %49 = math.tanh %48 : vector<8x128xf32>
      %50 = arith.mulf %45, %49 : vector<8x128xf32>
      %51 = arith.index_cast %21 : i32 to index
      %c0_27 = arith.constant 0 : index
      %52 = vector.load %arg9[%51, %c0_27] : memref<64x128xf32, #tpu.memory_space<vmem>>, vector<8x128xf32>
      tpu.vector_store %arg9[%51, %c0_27], %50 {strides = array<i32>} : memref<64x128xf32, #tpu.memory_space<vmem>>, vector<8x128xf32>,
      %c1_i32 = arith.constant 1 : i32
      %c8_i32_28 = arith.constant 8 : i32
      %53 = arith.muli %c1_i32, %c8_i32_28 : i32
      %54 = tpu.assume_multiple %53, 8 : i32
      %55 = arith.index_cast %54 : i32 to index
      %c0_29 = arith.constant 0 : index
      %56 = vector.load %arg8[%55, %c0_29] : memref<64x512xf32, #tpu.memory_space<vmem>>, vector<8x512xf32>
      %cst_30 = arith.constant dense<0.000000e+00> : vector<8x512xf32>
      %57 = tpu.matmul %50, %17, %cst_30 {dimension_numbers = #tpu.dot_dimension_numbers<[1], [0], [0], [1], [0, 0, 1, 1], [], []>} : vector<8x128xf32>, vector<128x512xf32>, vector<8x512xf32> -> vector<8x512xf32>
      %58 = arith.addf %56, %57 : vector<8x512xf32>
      %59 = vector.extract_strided_slice %58 {offsets = [0, 0], sizes = [8, 128], strides = [1, 1]} : vector<8x512xf32> to vector<8x128xf32>
      %60 = arith.negf %59 : vector<8x128xf32>
      %61 = math.exp %60 : vector<8x128xf32>
      %cst_31 = arith.constant 1.000000e+00 : f32
      %62 = vector.broadcast %cst_31 : f32 to vector<8x128xf32>
      %63 = arith.addf %62, %61 : vector<8x128xf32>
      %64 = arith.divf %62, %63 : vector<8x128xf32>
      %65 = vector.extract_strided_slice %58 {offsets = [0, 128], sizes = [8, 128], strides = [1, 1]} : vector<8x512xf32> to vector<8x128xf32>
      %66 = arith.negf %65 : vector<8x128xf32>
      %67 = math.exp %66 : vector<8x128xf32>
      %cst_32 = arith.constant 1.000000e+00 : f32
      %68 = vector.broadcast %cst_32 : f32 to vector<8x128xf32>
      %69 = arith.addf %68, %67 : vector<8x128xf32>
      %70 = arith.divf %68, %69 : vector<8x128xf32>
      %71 = vector.extract_strided_slice %58 {offsets = [0, 256], sizes = [8, 128], strides = [1, 1]} : vector<8x512xf32> to vector<8x128xf32>
      %72 = math.tanh %71 : vector<8x128xf32>
      %73 = vector.extract_strided_slice %58 {offsets = [0, 384], sizes = [8, 128], strides = [1, 1]} : vector<8x512xf32> to vector<8x128xf32>
      %74 = arith.negf %73 : vector<8x128xf32>
      %75 = math.exp %74 : vector<8x128xf32>
      %cst_33 = arith.constant 1.000000e+00 : f32
      %76 = vector.broadcast %cst_33 : f32 to vector<8x128xf32>
      %77 = arith.addf %76, %75 : vector<8x128xf32>
      %78 = arith.divf %76, %77 : vector<8x128xf32>
      %79 = arith.mulf %70, %48 : vector<8x128xf32>
      %80 = arith.mulf %64, %72 : vector<8x128xf32>
      %81 = arith.addf %79, %80 : vector<8x128xf32>
      %82 = math.tanh %81 : vector<8x128xf32>
      %83 = arith.mulf %78, %82 : vector<8x128xf32>
      %84 = arith.index_cast %54 : i32 to index
      %c0_34 = arith.constant 0 : index
      %85 = vector.load %arg9[%84, %c0_34] : memref<64x128xf32, #tpu.memory_space<vmem>>, vector<8x128xf32>
      tpu.vector_store %arg9[%84, %c0_34], %83 {strides = array<i32>} : memref<64x128xf32, #tpu.memory_space<vmem>>, vector<8x128xf32>,
      %c2_i32 = arith.constant 2 : i32
      %c8_i32_35 = arith.constant 8 : i32
      %86 = arith.muli %c2_i32, %c8_i32_35 : i32
      %87 = tpu.assume_multiple %86, 8 : i32
      %88 = arith.index_cast %87 : i32 to index
      %c0_36 = arith.constant 0 : index
      %89 = vector.load %arg8[%88, %c0_36] : memref<64x512xf32, #tpu.memory_space<vmem>>, vector<8x512xf32>
      %cst_37 = arith.constant dense<0.000000e+00> : vector<8x512xf32>
      %90 = tpu.matmul %83, %17, %cst_37 {dimension_numbers = #tpu.dot_dimension_numbers<[1], [0], [0], [1], [0, 0, 1, 1], [], []>} : vector<8x128xf32>, vector<128x512xf32>, vector<8x512xf32> -> vector<8x512xf32>
      %91 = arith.addf %89, %90 : vector<8x512xf32>
      %92 = vector.extract_strided_slice %91 {offsets = [0, 0], sizes = [8, 128], strides = [1, 1]} : vector<8x512xf32> to vector<8x128xf32>
      %93 = arith.negf %92 : vector<8x128xf32>
      %94 = math.exp %93 : vector<8x128xf32>
      %cst_38 = arith.constant 1.000000e+00 : f32
      %95 = vector.broadcast %cst_38 : f32 to vector<8x128xf32>
      %96 = arith.addf %95, %94 : vector<8x128xf32>
      %97 = arith.divf %95, %96 : vector<8x128xf32>
      %98 = vector.extract_strided_slice %91 {offsets = [0, 128], sizes = [8, 128], strides = [1, 1]} : vector<8x512xf32> to vector<8x128xf32>
      %99 = arith.negf %98 : vector<8x128xf32>
      %100 = math.exp %99 : vector<8x128xf32>
      %cst_39 = arith.constant 1.000000e+00 : f32
      %101 = vector.broadcast %cst_39 : f32 to vector<8x128xf32>
      %102 = arith.addf %101, %100 : vector<8x128xf32>
      %103 = arith.divf %101, %102 : vector<8x128xf32>
      %104 = vector.extract_strided_slice %91 {offsets = [0, 256], sizes = [8, 128], strides = [1, 1]} : vector<8x512xf32> to vector<8x128xf32>
      %105 = math.tanh %104 : vector<8x128xf32>
      %106 = vector.extract_strided_slice %91 {offsets = [0, 384], sizes = [8, 128], strides = [1, 1]} : vector<8x512xf32> to vector<8x128xf32>
      %107 = arith.negf %106 : vector<8x128xf32>
      %108 = math.exp %107 : vector<8x128xf32>
      %cst_40 = arith.constant 1.000000e+00 : f32
      %109 = vector.broadcast %cst_40 : f32 to vector<8x128xf32>
      %110 = arith.addf %109, %108 : vector<8x128xf32>
      %111 = arith.divf %109, %110 : vector<8x128xf32>
      %112 = arith.mulf %103, %81 : vector<8x128xf32>
      %113 = arith.mulf %97, %105 : vector<8x128xf32>
      %114 = arith.addf %112, %113 : vector<8x128xf32>
      %115 = math.tanh %114 : vector<8x128xf32>
      %116 = arith.mulf %111, %115 : vector<8x128xf32>
      %117 = arith.index_cast %87 : i32 to index
      %c0_41 = arith.constant 0 : index
      %118 = vector.load %arg9[%117, %c0_41] : memref<64x128xf32, #tpu.memory_space<vmem>>, vector<8x128xf32>
      tpu.vector_store %arg9[%117, %c0_41], %116 {strides = array<i32>} : memref<64x128xf32, #tpu.memory_space<vmem>>, vector<8x128xf32>,
      %c3_i32 = arith.constant 3 : i32
      %c8_i32_42 = arith.constant 8 : i32
      %119 = arith.muli %c3_i32, %c8_i32_42 : i32
      %120 = tpu.assume_multiple %119, 8 : i32
      %121 = arith.index_cast %120 : i32 to index
      %c0_43 = arith.constant 0 : index
      %122 = vector.load %arg8[%121, %c0_43] : memref<64x512xf32, #tpu.memory_space<vmem>>, vector<8x512xf32>
      %cst_44 = arith.constant dense<0.000000e+00> : vector<8x512xf32>
      %123 = tpu.matmul %116, %17, %cst_44 {dimension_numbers = #tpu.dot_dimension_numbers<[1], [0], [0], [1], [0, 0, 1, 1], [], []>} : vector<8x128xf32>, vector<128x512xf32>, vector<8x512xf32> -> vector<8x512xf32>
      %124 = arith.addf %122, %123 : vector<8x512xf32>
      %125 = vector.extract_strided_slice %124 {offsets = [0, 0], sizes = [8, 128], strides = [1, 1]} : vector<8x512xf32> to vector<8x128xf32>
      %126 = arith.negf %125 : vector<8x128xf32>
      %127 = math.exp %126 : vector<8x128xf32>
      %cst_45 = arith.constant 1.000000e+00 : f32
      %128 = vector.broadcast %cst_45 : f32 to vector<8x128xf32>
      %129 = arith.addf %128, %127 : vector<8x128xf32>
      %130 = arith.divf %128, %129 : vector<8x128xf32>
      %131 = vector.extract_strided_slice %124 {offsets = [0, 128], sizes = [8, 128], strides = [1, 1]} : vector<8x512xf32> to vector<8x128xf32>
      %132 = arith.negf %131 : vector<8x128xf32>
      %133 = math.exp %132 : vector<8x128xf32>
      %cst_46 = arith.constant 1.000000e+00 : f32
      %134 = vector.broadcast %cst_46 : f32 to vector<8x128xf32>
      %135 = arith.addf %134, %133 : vector<8x128xf32>
      %136 = arith.divf %134, %135 : vector<8x128xf32>
      %137 = vector.extract_strided_slice %124 {offsets = [0, 256], sizes = [8, 128], strides = [1, 1]} : vector<8x512xf32> to vector<8x128xf32>
      %138 = math.tanh %137 : vector<8x128xf32>
      %139 = vector.extract_strided_slice %124 {offsets = [0, 384], sizes = [8, 128], strides = [1, 1]} : vector<8x512xf32> to vector<8x128xf32>
      %140 = arith.negf %139 : vector<8x128xf32>
      %141 = math.exp %140 : vector<8x128xf32>
      %cst_47 = arith.constant 1.000000e+00 : f32
      %142 = vector.broadcast %cst_47 : f32 to vector<8x128xf32>
      %143 = arith.addf %142, %141 : vector<8x128xf32>
      %144 = arith.divf %142, %143 : vector<8x128xf32>
      %145 = arith.mulf %136, %114 : vector<8x128xf32>
      %146 = arith.mulf %130, %138 : vector<8x128xf32>
      %147 = arith.addf %145, %146 : vector<8x128xf32>
      %148 = math.tanh %147 : vector<8x128xf32>
      %149 = arith.mulf %144, %148 : vector<8x128xf32>
      %150 = arith.index_cast %120 : i32 to index
      %c0_48 = arith.constant 0 : index
      %151 = vector.load %arg9[%150, %c0_48] : memref<64x128xf32, #tpu.memory_space<vmem>>, vector<8x128xf32>
      tpu.vector_store %arg9[%150, %c0_48], %149 {strides = array<i32>} : memref<64x128xf32, #tpu.memory_space<vmem>>, vector<8x128xf32>,
      %c4_i32 = arith.constant 4 : i32
      %c8_i32_49 = arith.constant 8 : i32
      %152 = arith.muli %c4_i32, %c8_i32_49 : i32
      %153 = tpu.assume_multiple %152, 8 : i32
      %154 = arith.index_cast %153 : i32 to index
      %c0_50 = arith.constant 0 : index
      %155 = vector.load %arg8[%154, %c0_50] : memref<64x512xf32, #tpu.memory_space<vmem>>, vector<8x512xf32>
      %cst_51 = arith.constant dense<0.000000e+00> : vector<8x512xf32>
      %156 = tpu.matmul %149, %17, %cst_51 {dimension_numbers = #tpu.dot_dimension_numbers<[1], [0], [0], [1], [0, 0, 1, 1], [], []>} : vector<8x128xf32>, vector<128x512xf32>, vector<8x512xf32> -> vector<8x512xf32>
      %157 = arith.addf %155, %156 : vector<8x512xf32>
      %158 = vector.extract_strided_slice %157 {offsets = [0, 0], sizes = [8, 128], strides = [1, 1]} : vector<8x512xf32> to vector<8x128xf32>
      %159 = arith.negf %158 : vector<8x128xf32>
      %160 = math.exp %159 : vector<8x128xf32>
      %cst_52 = arith.constant 1.000000e+00 : f32
      %161 = vector.broadcast %cst_52 : f32 to vector<8x128xf32>
      %162 = arith.addf %161, %160 : vector<8x128xf32>
      %163 = arith.divf %161, %162 : vector<8x128xf32>
      %164 = vector.extract_strided_slice %157 {offsets = [0, 128], sizes = [8, 128], strides = [1, 1]} : vector<8x512xf32> to vector<8x128xf32>
      %165 = arith.negf %164 : vector<8x128xf32>
      %166 = math.exp %165 : vector<8x128xf32>
      %cst_53 = arith.constant 1.000000e+00 : f32
      %167 = vector.broadcast %cst_53 : f32 to vector<8x128xf32>
      %168 = arith.addf %167, %166 : vector<8x128xf32>
      %169 = arith.divf %167, %168 : vector<8x128xf32>
      %170 = vector.extract_strided_slice %157 {offsets = [0, 256], sizes = [8, 128], strides = [1, 1]} : vector<8x512xf32> to vector<8x128xf32>
      %171 = math.tanh %170 : vector<8x128xf32>
      %172 = vector.extract_strided_slice %157 {offsets = [0, 384], sizes = [8, 128], strides = [1, 1]} : vector<8x512xf32> to vector<8x128xf32>
      %173 = arith.negf %172 : vector<8x128xf32>
      %174 = math.exp %173 : vector<8x128xf32>
      %cst_54 = arith.constant 1.000000e+00 : f32
      %175 = vector.broadcast %cst_54 : f32 to vector<8x128xf32>
      %176 = arith.addf %175, %174 : vector<8x128xf32>
      %177 = arith.divf %175, %176 : vector<8x128xf32>
      %178 = arith.mulf %169, %147 : vector<8x128xf32>
      %179 = arith.mulf %163, %171 : vector<8x128xf32>
      %180 = arith.addf %178, %179 : vector<8x128xf32>
      %181 = math.tanh %180 : vector<8x128xf32>
      %182 = arith.mulf %177, %181 : vector<8x128xf32>
      %183 = arith.index_cast %153 : i32 to index
      %c0_55 = arith.constant 0 : index
      %184 = vector.load %arg9[%183, %c0_55] : memref<64x128xf32, #tpu.memory_space<vmem>>, vector<8x128xf32>
      tpu.vector_store %arg9[%183, %c0_55], %182 {strides = array<i32>} : memref<64x128xf32, #tpu.memory_space<vmem>>, vector<8x128xf32>,
      %c5_i32 = arith.constant 5 : i32
      %c8_i32_56 = arith.constant 8 : i32
      %185 = arith.muli %c5_i32, %c8_i32_56 : i32
      %186 = tpu.assume_multiple %185, 8 : i32
      %187 = arith.index_cast %186 : i32 to index
      %c0_57 = arith.constant 0 : index
      %188 = vector.load %arg8[%187, %c0_57] : memref<64x512xf32, #tpu.memory_space<vmem>>, vector<8x512xf32>
      %cst_58 = arith.constant dense<0.000000e+00> : vector<8x512xf32>
      %189 = tpu.matmul %182, %17, %cst_58 {dimension_numbers = #tpu.dot_dimension_numbers<[1], [0], [0], [1], [0, 0, 1, 1], [], []>} : vector<8x128xf32>, vector<128x512xf32>, vector<8x512xf32> -> vector<8x512xf32>
      %190 = arith.addf %188, %189 : vector<8x512xf32>
      %191 = vector.extract_strided_slice %190 {offsets = [0, 0], sizes = [8, 128], strides = [1, 1]} : vector<8x512xf32> to vector<8x128xf32>
      %192 = arith.negf %191 : vector<8x128xf32>
      %193 = math.exp %192 : vector<8x128xf32>
      %cst_59 = arith.constant 1.000000e+00 : f32
      %194 = vector.broadcast %cst_59 : f32 to vector<8x128xf32>
      %195 = arith.addf %194, %193 : vector<8x128xf32>
      %196 = arith.divf %194, %195 : vector<8x128xf32>
      %197 = vector.extract_strided_slice %190 {offsets = [0, 128], sizes = [8, 128], strides = [1, 1]} : vector<8x512xf32> to vector<8x128xf32>
      %198 = arith.negf %197 : vector<8x128xf32>
      %199 = math.exp %198 : vector<8x128xf32>
      %cst_60 = arith.constant 1.000000e+00 : f32
      %200 = vector.broadcast %cst_60 : f32 to vector<8x128xf32>
      %201 = arith.addf %200, %199 : vector<8x128xf32>
      %202 = arith.divf %200, %201 : vector<8x128xf32>
      %203 = vector.extract_strided_slice %190 {offsets = [0, 256], sizes = [8, 128], strides = [1, 1]} : vector<8x512xf32> to vector<8x128xf32>
      %204 = math.tanh %203 : vector<8x128xf32>
      %205 = vector.extract_strided_slice %190 {offsets = [0, 384], sizes = [8, 128], strides = [1, 1]} : vector<8x512xf32> to vector<8x128xf32>
      %206 = arith.negf %205 : vector<8x128xf32>
      %207 = math.exp %206 : vector<8x128xf32>
      %cst_61 = arith.constant 1.000000e+00 : f32
      %208 = vector.broadcast %cst_61 : f32 to vector<8x128xf32>
      %209 = arith.addf %208, %207 : vector<8x128xf32>
      %210 = arith.divf %208, %209 : vector<8x128xf32>
      %211 = arith.mulf %202, %180 : vector<8x128xf32>
      %212 = arith.mulf %196, %204 : vector<8x128xf32>
      %213 = arith.addf %211, %212 : vector<8x128xf32>
      %214 = math.tanh %213 : vector<8x128xf32>
      %215 = arith.mulf %210, %214 : vector<8x128xf32>
      %216 = arith.index_cast %186 : i32 to index
      %c0_62 = arith.constant 0 : index
      %217 = vector.load %arg9[%216, %c0_62] : memref<64x128xf32, #tpu.memory_space<vmem>>, vector<8x128xf32>
      tpu.vector_store %arg9[%216, %c0_62], %215 {strides = array<i32>} : memref<64x128xf32, #tpu.memory_space<vmem>>, vector<8x128xf32>,
      %c6_i32 = arith.constant 6 : i32
      %c8_i32_63 = arith.constant 8 : i32
      %218 = arith.muli %c6_i32, %c8_i32_63 : i32
      %219 = tpu.assume_multiple %218, 8 : i32
      %220 = arith.index_cast %219 : i32 to index
      %c0_64 = arith.constant 0 : index
      %221 = vector.load %arg8[%220, %c0_64] : memref<64x512xf32, #tpu.memory_space<vmem>>, vector<8x512xf32>
      %cst_65 = arith.constant dense<0.000000e+00> : vector<8x512xf32>
      %222 = tpu.matmul %215, %17, %cst_65 {dimension_numbers = #tpu.dot_dimension_numbers<[1], [0], [0], [1], [0, 0, 1, 1], [], []>} : vector<8x128xf32>, vector<128x512xf32>, vector<8x512xf32> -> vector<8x512xf32>
      %223 = arith.addf %221, %222 : vector<8x512xf32>
      %224 = vector.extract_strided_slice %223 {offsets = [0, 0], sizes = [8, 128], strides = [1, 1]} : vector<8x512xf32> to vector<8x128xf32>
      %225 = arith.negf %224 : vector<8x128xf32>
      %226 = math.exp %225 : vector<8x128xf32>
      %cst_66 = arith.constant 1.000000e+00 : f32
      %227 = vector.broadcast %cst_66 : f32 to vector<8x128xf32>
      %228 = arith.addf %227, %226 : vector<8x128xf32>
      %229 = arith.divf %227, %228 : vector<8x128xf32>
      %230 = vector.extract_strided_slice %223 {offsets = [0, 128], sizes = [8, 128], strides = [1, 1]} : vector<8x512xf32> to vector<8x128xf32>
      %231 = arith.negf %230 : vector<8x128xf32>
      %232 = math.exp %231 : vector<8x128xf32>
      %cst_67 = arith.constant 1.000000e+00 : f32
      %233 = vector.broadcast %cst_67 : f32 to vector<8x128xf32>
      %234 = arith.addf %233, %232 : vector<8x128xf32>
      %235 = arith.divf %233, %234 : vector<8x128xf32>
      %236 = vector.extract_strided_slice %223 {offsets = [0, 256], sizes = [8, 128], strides = [1, 1]} : vector<8x512xf32> to vector<8x128xf32>
      %237 = math.tanh %236 : vector<8x128xf32>
      %238 = vector.extract_strided_slice %223 {offsets = [0, 384], sizes = [8, 128], strides = [1, 1]} : vector<8x512xf32> to vector<8x128xf32>
      %239 = arith.negf %238 : vector<8x128xf32>
      %240 = math.exp %239 : vector<8x128xf32>
      %cst_68 = arith.constant 1.000000e+00 : f32
      %241 = vector.broadcast %cst_68 : f32 to vector<8x128xf32>
      %242 = arith.addf %241, %240 : vector<8x128xf32>
      %243 = arith.divf %241, %242 : vector<8x128xf32>
      %244 = arith.mulf %235, %213 : vector<8x128xf32>
      %245 = arith.mulf %229, %237 : vector<8x128xf32>
      %246 = arith.addf %244, %245 : vector<8x128xf32>
      %247 = math.tanh %246 : vector<8x128xf32>
      %248 = arith.mulf %243, %247 : vector<8x128xf32>
      %249 = arith.index_cast %219 : i32 to index
      %c0_69 = arith.constant 0 : index
      %250 = vector.load %arg9[%249, %c0_69] : memref<64x128xf32, #tpu.memory_space<vmem>>, vector<8x128xf32>
      tpu.vector_store %arg9[%249, %c0_69], %248 {strides = array<i32>} : memref<64x128xf32, #tpu.memory_space<vmem>>, vector<8x128xf32>,
      %c7_i32 = arith.constant 7 : i32
      %c8_i32_70 = arith.constant 8 : i32
      %251 = arith.muli %c7_i32, %c8_i32_70 : i32
      %252 = tpu.assume_multiple %251, 8 : i32
      %253 = arith.index_cast %252 : i32 to index
      %c0_71 = arith.constant 0 : index
      %254 = vector.load %arg8[%253, %c0_71] : memref<64x512xf32, #tpu.memory_space<vmem>>, vector<8x512xf32>
      %cst_72 = arith.constant dense<0.000000e+00> : vector<8x512xf32>
      %255 = tpu.matmul %248, %17, %cst_72 {dimension_numbers = #tpu.dot_dimension_numbers<[1], [0], [0], [1], [0, 0, 1, 1], [], []>} : vector<8x128xf32>, vector<128x512xf32>, vector<8x512xf32> -> vector<8x512xf32>
      %256 = arith.addf %254, %255 : vector<8x512xf32>
      %257 = vector.extract_strided_slice %256 {offsets = [0, 0], sizes = [8, 128], strides = [1, 1]} : vector<8x512xf32> to vector<8x128xf32>
      %258 = arith.negf %257 : vector<8x128xf32>
      %259 = math.exp %258 : vector<8x128xf32>
      %cst_73 = arith.constant 1.000000e+00 : f32
      %260 = vector.broadcast %cst_73 : f32 to vector<8x128xf32>
      %261 = arith.addf %260, %259 : vector<8x128xf32>
      %262 = arith.divf %260, %261 : vector<8x128xf32>
      %263 = vector.extract_strided_slice %256 {offsets = [0, 128], sizes = [8, 128], strides = [1, 1]} : vector<8x512xf32> to vector<8x128xf32>
      %264 = arith.negf %263 : vector<8x128xf32>
      %265 = math.exp %264 : vector<8x128xf32>
      %cst_74 = arith.constant 1.000000e+00 : f32
      %266 = vector.broadcast %cst_74 : f32 to vector<8x128xf32>
      %267 = arith.addf %266, %265 : vector<8x128xf32>
      %268 = arith.divf %266, %267 : vector<8x128xf32>
      %269 = vector.extract_strided_slice %256 {offsets = [0, 256], sizes = [8, 128], strides = [1, 1]} : vector<8x512xf32> to vector<8x128xf32>
      %270 = math.tanh %269 : vector<8x128xf32>
      %271 = vector.extract_strided_slice %256 {offsets = [0, 384], sizes = [8, 128], strides = [1, 1]} : vector<8x512xf32> to vector<8x128xf32>
      %272 = arith.negf %271 : vector<8x128xf32>
      %273 = math.exp %272 : vector<8x128xf32>
      %cst_75 = arith.constant 1.000000e+00 : f32
      %274 = vector.broadcast %cst_75 : f32 to vector<8x128xf32>
      %275 = arith.addf %274, %273 : vector<8x128xf32>
      %276 = arith.divf %274, %275 : vector<8x128xf32>
      %277 = arith.mulf %268, %246 : vector<8x128xf32>
      %278 = arith.mulf %262, %270 : vector<8x128xf32>
      %279 = arith.addf %277, %278 : vector<8x128xf32>
      %280 = math.tanh %279 : vector<8x128xf32>
      %281 = arith.mulf %276, %280 : vector<8x128xf32>
      %282 = arith.index_cast %252 : i32 to index
      %c0_76 = arith.constant 0 : index
      %283 = vector.load %arg9[%282, %c0_76] : memref<64x128xf32, #tpu.memory_space<vmem>>, vector<8x128xf32>
      tpu.vector_store %arg9[%282, %c0_76], %281 {strides = array<i32>} : memref<64x128xf32, #tpu.memory_space<vmem>>, vector<8x128xf32>,
      %c8_i32_77 = arith.constant 8 : i32
    } else {
    }
    %c0 = arith.constant 0 : index
    %c0_1 = arith.constant 0 : index
    %3 = vector.load %arg9[%c0, %c0_1] : memref<64x128xf32, #tpu.memory_space<vmem>>, vector<64x128xf32>
    %c0_2 = arith.constant 0 : index
    %c0_3 = arith.constant 0 : index
    %4 = vector.load %arg5[%c0_2, %c0_3] : memref<128x256xf32, #tpu.memory_space<vmem>>, vector<128x256xf32>
    %cst = arith.constant dense<0.000000e+00> : vector<64x256xf32>
    %5 = tpu.matmul %3, %4, %cst {dimension_numbers = #tpu.dot_dimension_numbers<[1], [0], [0], [1], [0, 0, 1, 1], [], []>} : vector<64x128xf32>, vector<128x256xf32>, vector<64x256xf32> -> vector<64x256xf32>
    %c0_4 = arith.constant 0 : index
    %c0_5 = arith.constant 0 : index
    %6 = vector.load %arg6[%c0_4, %c0_5] : memref<1x256xf32, #tpu.memory_space<vmem>>, vector<1x256xf32>
    %7 = vector.broadcast %6 : vector<1x256xf32> to vector<64x256xf32>
    %8 = arith.addf %5, %7 : vector<64x256xf32>
    %c0_6 = arith.constant 0 : index
    %c0_7 = arith.constant 0 : index
    %9 = vector.load %arg7[%c0_6, %c0_7] : memref<64x256xf32, #tpu.memory_space<vmem>>, vector<64x256xf32>
    tpu.vector_store %arg7[%c0_6, %c0_7], %8 {strides = array<i32>} : memref<64x256xf32, #tpu.memory_space<vmem>>, vector<64x256xf32>,
    return
  }
  func.func @transform_0(%arg0: i32) -> (i32, i32) {
    %c0_i32 = arith.constant 0 : i32
    %c0_i32_0 = arith.constant 0 : i32
    %c0_i32_1 = arith.constant 0 : i32
    return %c0_i32, %c0_i32_0 : i32, i32
  }
  func.func @transform_1(%arg0: i32) -> (i32, i32) {
    %c0_i32 = arith.constant 0 : i32
    %c0_i32_0 = arith.constant 0 : i32
    %c0_i32_1 = arith.constant 0 : i32
    return %c0_i32, %c0_i32_0 : i32, i32
  }
  func.func @transform_2(%arg0: i32) -> (i32, i32) {
    %c0_i32 = arith.constant 0 : i32
    %c0_i32_0 = arith.constant 0 : i32
    %c0_i32_1 = arith.constant 0 : i32
    return %c0_i32, %c0_i32_0 : i32, i32
  }
  func.func @transform_3(%arg0: i32) -> (i32, i32) {
    %c0_i32 = arith.constant 0 : i32
    %c0_i32_0 = arith.constant 0 : i32
    %c0_i32_1 = arith.constant 0 : i32
    return %c0_i32, %c0_i32_0 : i32, i32
  }
  func.func @transform_4(%arg0: i32) -> (i32, i32) {
    %c0_i32 = arith.constant 0 : i32
    %c0_i32_0 = arith.constant 0 : i32
    return %c0_i32, %arg0 : i32, i32
  }
  func.func @transform_5(%arg0: i32) -> (i32, i32) {
    %c0_i32 = arith.constant 0 : i32
    %c0_i32_0 = arith.constant 0 : i32
    return %c0_i32, %arg0 : i32, i32
  }
  func.func @transform_6(%arg0: i32) -> (i32, i32) {
    %c0_i32 = arith.constant 0 : i32
    %c0_i32_0 = arith.constant 0 : i32
    return %c0_i32, %arg0 : i32, i32
  }
}

</mosaic_0001>

<bundles_post_ra>
// kernel: decoder_rnn_forward.1
= control target key start
LH: loop header
LB: loop body
LE: loop exit
PB: predicated region body
PF: predicated region fallthrough
CT: control target
= control target key end

     0   :  { %11 = vsyncpa [#allocation5], 0  ;;  %s3744_s0 = inlined_call_operand.vmem [shape: f32[64,128], index: 0, kind: input, shape index: {}]   ;;  %s3745_s1 = inlined_call_operand.hbm [shape: f32[128,512], index: 1, kind: input, shape index: {}]   ;;  %s3746_s2 = inlined_call_operand.hbm [shape: f32[128,512], index: 2, kind: input, shape index: {}]   ;;  %s3747_s3 = inlined_call_operand.vmem [shape: f32[1,512], index: 3, kind: input, shape index: {}]   ;;  %s3748_s4 = inlined_call_operand.vmem [shape: f32[128,256], index: 4, kind: input, shape index: {}]   ;;  %s3749_s5 = inlined_call_operand.vmem [shape: f32[1,256], index: 5, kind: input, shape index: {}]   ;;  %s3750_s6 = inlined_call_operand.vmem [shape: f32[64,256], index: 6, kind: output, shape index: {}]  }
   0x1   :  { %12 = vsyncpa [#allocation7], 0  ;;  %s2973_s21 = smov [#allocation4]   ;;  %s2925_s25 = scalar_lea.hbm %s3745_s1, 8192 }
   0x2   :  { %s20_s22 = sshll.u32 %s2973_s21, 4  ;;  %p2926_p0 = scmp.ne.s32.totalorder %s3745_s1, %s2925_s25  ;;  %s21_s22 = int_to_ptr.vmem [resolvable:$true] %s20_s22 }
   0x3   :  { %p2929_p1 = scmp.lt.u32.totalorder %s2925_s25, %s3745_s1 }
   0x5   :  { %p2931_p2 = pnand %p2929_p1, %p2926_p0 }
   0x7   :  { %2934 = shalt.err (!%p2931_p2)
}
   0x8   :  { %s2935_s30 = scalar_lea.vmem %s21_s22, 8192  ;;  %p2940_p4 = scmp.lt.s32.totalorder %s21_s22, %s21_s22 }
   0x9   :  { %p2936_p3 = scmp.ne.s32.totalorder %s21_s22, %s2935_s30  ;;  %p2941_p5 = scmp.lt.s32.totalorder %s2935_s30, %s2935_s30 }
   0xb   :  { %p2942_p6 = por %p2941_p5, %p2940_p4 }
   0xd   :  { %p2943_p7 = pnand %p2942_p6, %p2936_p3 }
   0xf   :  { %2946 = shalt.err (!%p2943_p7)
}
  0x10   :  { %s2974_s7 = smov 512   ;;  %s2975_s8 = smov 32  }
  0x11   :  { %26 = dma.hbm_to_vmem [thread:$0]  %s3745_s1, 8192, %s21_s22, [#allocation5], %s2974_s7, %s2974_s7, %s2975_s8  }
  0x12   :  { %s2976_s11 = smov [#allocation6]   ;;  %s2947_s15 = scalar_lea.hbm %s3746_s2, 8192 }
  0x13   :  { %s32_s12 = sshll.u32 %s2976_s11, 4  ;;  %p2948_p8 = scmp.ne.s32.totalorder %s3746_s2, %s2947_s15  ;;  %s33_s12 = int_to_ptr.vmem [resolvable:$true] %s32_s12 }
  0x14   :  { %p2951_p9 = scmp.lt.u32.totalorder %s2947_s15, %s3746_s2 }
  0x16   :  { %p2953_p10 = pnand %p2951_p9, %p2948_p8 }
  0x18   :  { %2956 = shalt.err (!%p2953_p10)
}
  0x19   :  { %s2957_s20 = scalar_lea.vmem %s33_s12, 8192  ;;  %p2962_p12 = scmp.lt.s32.totalorder %s33_s12, %s33_s12 }
  0x1a   :  { %p2958_p11 = scmp.ne.s32.totalorder %s33_s12, %s2957_s20  ;;  %p2963_p13 = scmp.lt.s32.totalorder %s2957_s20, %s2957_s20 }
  0x1c   :  { %p2964_p0 = por %p2963_p13, %p2962_p12 }
  0x1e   :  { %p2965_p1 = pnand %p2964_p0, %p2958_p11 }
  0x20   :  { %2968 = shalt.err (!%p2965_p1)
}
  0x21   :  { %38 = dma.hbm_to_vmem [thread:$0]  %s3746_s2, 8192, %s33_s12, [#allocation7], %s2974_s7, %s2974_s7, %s2975_s8  }
  0x22   :  { %2969 = dma.done.wait [#allocation5], 8192  }
  0x23   :  { %2970 = vsyncadd [#allocation5], 4294959104 }
  0x24   :  { %2971 = dma.done.wait [#allocation7], 8192  }
  0x25   :  { %2972 = vsyncadd [#allocation7], 4294959104  ;;  %v3753_v0 = vmov 0.0   ;;  %v64_v1 = vld [vmem:[#allocation4 + $0x8] sm:$0xff]  ;;  %v63_v3 = vld [vmem:[#allocation4] sm:$0xff] }
  0x26   :  { %213 = vmatprep.mubr.f32.mxu1 %v3753_v0  ;;  %542 = vmatprep.mubr.f32.mxu0 %v3753_v0  ;;  %v68_v2 = vld [vmem:[#allocation4 + $0x28] sm:$0xff]  ;;  %v67_v5 = vld [vmem:[#allocation4 + $0x20] sm:$0xff] }
  0x27   :  { %v2120_v4 = vpack.c.bf16 %v68_v2, %v64_v1  ;;  %v408_v6 = vld [vmem:[#allocation6 + $0x8] sm:$0xff]  ;;  %v2122_v8 = vpack.c.bf16 %v67_v5, %v63_v3  ;;  %v407_v10 = vld [vmem:[#allocation6] sm:$0xff] }
  0x28   :  { %v412_v7 = vld [vmem:[#allocation6 + $0x28] sm:$0xff]  ;;  %v411_v11 = vld [vmem:[#allocation6 + $0x20] sm:$0xff] }
  0x29   :  { %v3039_v9 = vpack.c.bf16 %v412_v7, %v408_v6  ;;  %v72_v12 = vld [vmem:[#allocation4 + $0x48] sm:$0xff]  ;;  %2121 = vmatprep.subr.bf16.mxu1 %v2120_v4  ;;  %v3041_v13 = vpack.c.bf16 %v411_v11, %v407_v10  ;;  %v71_v15 = vld [vmem:[#allocation4 + $0x40] sm:$0xff] }
  0x2a   :  { %v76_v14 = vld [vmem:[#allocation4 + $0x68] sm:$0xff]  ;;  %v75_v16 = vld [vmem:[#allocation4 + $0x60] sm:$0xff]  ;;  %2123 = vmatpush1.bf16.msra.mxu1 %v2122_v8 }
  0x2b   :  { %2185 = vmatprep.subr.bf16.mxu0 %v3039_v9  ;;  %v2124_v17 = vpack.c.bf16 %v76_v14, %v72_v12  ;;  %v2126_v18 = vpack.c.bf16 %v75_v16, %v71_v15  ;;  %v416_v19 = vld [vmem:[#allocation6 + $0x48] sm:$0xff]  ;;  %v415_v21 = vld [vmem:[#allocation6 + $0x40] sm:$0xff] }
  0x2c   :  { %v420_v20 = vld [vmem:[#allocation6 + $0x68] sm:$0xff]  ;;  %2187 = vmatpush1.bf16.msra.mxu0 %v3041_v13  ;;  %v419_v23 = vld [vmem:[#allocation6 + $0x60] sm:$0xff] }
  0x2d   :  { %v3045_v22 = vpack.c.bf16 %v420_v20, %v416_v19  ;;  %v80_v24 = vld [vmem:[#allocation4 + $0x88] sm:$0xff]  ;;  %2125 = vmatprep.subr.bf16.mxu1 %v2124_v17  ;;  %v3047_v26 = vpack.c.bf16 %v419_v23, %v415_v21  ;;  %v79_v28 = vld [vmem:[#allocation4 + $0x80] sm:$0xff] }
  0x2e   :  { %v84_v25 = vld [vmem:[#allocation4 + $0xa8] sm:$0xff]  ;;  %v83_v29 = vld [vmem:[#allocation4 + $0xa0] sm:$0xff]  ;;  %2127 = vmatpush1.bf16.msra.mxu1 %v2126_v18 }
  0x2f   :  { %v2128_v27 = vpack.c.bf16 %v84_v25, %v80_v24  ;;  %v424_v30 = vld [vmem:[#allocation6 + $0x88] sm:$0xff]  ;;  %2189 = vmatprep.subr.bf16.mxu0 %v3045_v22  ;;  %v423_v32 = vld [vmem:[#allocation6 + $0x80] sm:$0xff]  ;;  %v2130_v34 = vpack.c.bf16 %v83_v29, %v79_v28 }
  0x30   :  { %v428_v31 = vld [vmem:[#allocation6 + $0xa8] sm:$0xff]  ;;  %v427_v33 = vld [vmem:[#allocation6 + $0xa0] sm:$0xff]  ;;  %2191 = vmatpush1.bf16.msra.mxu0 %v3047_v26 }
  0x31   :  { %v3050_v35 = vpack.c.bf16 %v428_v31, %v424_v30  ;;  %v88_v36 = vld [vmem:[#allocation4 + $0xc8] sm:$0xff]  ;;  %v87_v38 = vld [vmem:[#allocation4 + $0xc0] sm:$0xff]  ;;  %2129 = vmatprep.subr.bf16.mxu1 %v2128_v27  ;;  %v3053_v39 = vpack.c.bf16 %v427_v33, %v423_v32 }
  0x32   :  { %v92_v37 = vld [vmem:[#allocation4 + $0xe8] sm:$0xff]  ;;  %v91_v41 = vld [vmem:[#allocation4 + $0xe0] sm:$0xff]  ;;  %2131 = vmatpush1.bf16.msra.mxu1 %v2130_v34 }
  0x33   :  { %v2132_v40 = vpack.c.bf16 %v92_v37, %v88_v36  ;;  %v432_v42 = vld [vmem:[#allocation6 + $0xc8] sm:$0xff]  ;;  %2193 = vmatprep.subr.bf16.mxu0 %v3050_v35  ;;  %v431_v45 = vld [vmem:[#allocation6 + $0xc0] sm:$0xff]  ;;  %v2134_v49 = vpack.c.bf16 %v91_v41, %v87_v38  ;;  %v66_v37 = vld [vmem:[#allocation4 + $0x18] sm:$0xff] }
  0x34   :  { %v436_v43 = vld [vmem:[#allocation6 + $0xe8] sm:$0xff]  ;;  %v435_v46 = vld [vmem:[#allocation6 + $0xe0] sm:$0xff]  ;;  %2195 = vmatpush1.bf16.msra.mxu0 %v3053_v39  ;;  %v70_v38 = vld [vmem:[#allocation4 + $0x38] sm:$0xff] }
  0x35   :  { %v3056_v44 = vpack.c.bf16 %v436_v43, %v432_v42  ;;  %v96_v47 = vld [vmem:[#allocation4 + $0x108] sm:$0xff]  ;;  %2133 = vmatprep.subr.bf16.mxu1 %v2132_v40  ;;  %v3059_v52 = vpack.c.bf16 %v435_v46, %v431_v45  ;;  %v95_v54 = vld [vmem:[#allocation4 + $0x100] sm:$0xff]  ;;  %v2152_v42 = vpack.c.bf16 %v70_v38, %v66_v37  ;;  %v65_v43 = vld [vmem:[#allocation4 + $0x10] sm:$0xff] }
  0x36   :  { %v100_v48 = vld [vmem:[#allocation4 + $0x128] sm:$0xff]  ;;  %v99_v55 = vld [vmem:[#allocation4 + $0x120] sm:$0xff]  ;;  %2135 = vmatpush1.bf16.msra.mxu1 %v2134_v49  ;;  %v69_v45 = vld [vmem:[#allocation4 + $0x30] sm:$0xff] }
  0x37   :  { %v440_v50 = vld [vmem:[#allocation6 + $0x108] sm:$0xff]  ;;  %v2136_v53 = vpack.c.bf16 %v100_v48, %v96_v47  ;;  %v439_v56 = vld [vmem:[#allocation6 + $0x100] sm:$0xff]  ;;  %2197 = vmatprep.subr.bf16.mxu0 %v3056_v44  ;;  %v2138_v63 = vpack.c.bf16 %v99_v55, %v95_v54  ;;  %v74_v46 = vld [vmem:[#allocation4 + $0x58] sm:$0xff]  ;;  %v2154_v49 = vpack.c.bf16 %v69_v45, %v65_v43 }
  0x38   :  { %v444_v51 = vld [vmem:[#allocation6 + $0x128] sm:$0xff]  ;;  %v443_v58 = vld [vmem:[#allocation6 + $0x120] sm:$0xff]  ;;  %2199 = vmatpush1.bf16.msra.mxu0 %v3059_v52  ;;  %v78_v47 = vld [vmem:[#allocation4 + $0x78] sm:$0xff] }
  0x39   :  { %v3062_v57 = vpack.c.bf16 %v444_v51, %v440_v50  ;;  %v104_v59 = vld [vmem:[#allocation4 + $0x148] sm:$0xff]  ;;  %2137 = vmatprep.subr.bf16.mxu1 %v2136_v53  ;;  %v3065_v1 = vpack.c.bf16 %v443_v58, %v439_v56  ;;  %v103_v3 = vld [vmem:[#allocation4 + $0x140] sm:$0xff]  ;;  %v2156_v50 = vpack.c.bf16 %v78_v47, %v74_v46  ;;  %v73_v51 = vld [vmem:[#allocation4 + $0x50] sm:$0xff] }
  0x3a   :  { %v108_v60 = vld [vmem:[#allocation4 + $0x168] sm:$0xff]  ;;  %v107_v4 = vld [vmem:[#allocation4 + $0x160] sm:$0xff]  ;;  %2139 = vmatpush1.bf16.msra.mxu1 %v2138_v63  ;;  %v77_v53 = vld [vmem:[#allocation4 + $0x70] sm:$0xff] }
  0x3b   :  { %v448_v61 = vld [vmem:[#allocation6 + $0x148] sm:$0xff]  ;;  %v2140_v2 = vpack.c.bf16 %v108_v60, %v104_v59  ;;  %v447_v5 = vld [vmem:[#allocation6 + $0x140] sm:$0xff]  ;;  %2201 = vmatprep.subr.bf16.mxu0 %v3062_v57  ;;  %v2142_v14 = vpack.c.bf16 %v107_v4, %v103_v3  ;;  %v82_v54 = vld [vmem:[#allocation4 + $0x98] sm:$0xff]  ;;  %v2158_v58 = vpack.c.bf16 %v77_v53, %v73_v51 }
  0x3c   :  { %v452_v62 = vld [vmem:[#allocation6 + $0x168] sm:$0xff]  ;;  %v451_v7 = vld [vmem:[#allocation6 + $0x160] sm:$0xff]  ;;  %2203 = vmatpush1.bf16.msra.mxu0 %v3065_v1  ;;  %v86_v55 = vld [vmem:[#allocation4 + $0xb8] sm:$0xff] }
  0x3d   :  { %v3068_v6 = vpack.c.bf16 %v452_v62, %v448_v61  ;;  %v112_v8 = vld [vmem:[#allocation4 + $0x188] sm:$0xff]  ;;  %2141 = vmatprep.subr.bf16.mxu1 %v2140_v2  ;;  %v3071_v15 = vpack.c.bf16 %v451_v7, %v447_v5  ;;  %v111_v17 = vld [vmem:[#allocation4 + $0x180] sm:$0xff]  ;;  %v2160_v59 = vpack.c.bf16 %v86_v55, %v82_v54  ;;  %v81_v60 = vld [vmem:[#allocation4 + $0x90] sm:$0xff] }
  0x3e   :  { %v116_v10 = vld [vmem:[#allocation4 + $0x1a8] sm:$0xff]  ;;  %v115_v18 = vld [vmem:[#allocation4 + $0x1a0] sm:$0xff]  ;;  %2143 = vmatpush1.bf16.msra.mxu1 %v2142_v14  ;;  %v85_v61 = vld [vmem:[#allocation4 + $0xb0] sm:$0xff] }
  0x3f   :  { %v456_v11 = vld [vmem:[#allocation6 + $0x188] sm:$0xff]  ;;  %v2144_v16 = vpack.c.bf16 %v116_v10, %v112_v8  ;;  %v455_v19 = vld [vmem:[#allocation6 + $0x180] sm:$0xff]  ;;  %2205 = vmatprep.subr.bf16.mxu0 %v3068_v6  ;;  %v2146_v28 = vpack.c.bf16 %v115_v18, %v111_v17  ;;  %v90_v62 = vld [vmem:[#allocation4 + $0xd8] sm:$0xff]  ;;  %v2162_v3 = vpack.c.bf16 %v85_v61, %v81_v60 }
  0x40   :  { %v460_v12 = vld [vmem:[#allocation6 + $0x1a8] sm:$0xff]  ;;  %v459_v21 = vld [vmem:[#allocation6 + $0x1a0] sm:$0xff]  ;;  %2207 = vmatpush1.bf16.msra.mxu0 %v3071_v15  ;;  %v94_v63 = vld [vmem:[#allocation4 + $0xf8] sm:$0xff] }
  0x41   :  { %v3074_v20 = vpack.c.bf16 %v460_v12, %v456_v11  ;;  %v120_v23 = vld [vmem:[#allocation4 + $0x1c8] sm:$0xff]  ;;  %2145 = vmatprep.subr.bf16.mxu1 %v2144_v16  ;;  %v3077_v29 = vpack.c.bf16 %v459_v21, %v455_v19  ;;  %v119_v31 = vld [vmem:[#allocation4 + $0x1c0] sm:$0xff]  ;;  %v3109_v2 = vld [vmem:[%s3744_s0 + $0x10] sm:$0xff]  ;;  %v2164_v4 = vpack.c.bf16 %v94_v63, %v90_v62 }
  0x42   :  { %v124_v24 = vld [vmem:[#allocation4 + $0x1e8] sm:$0xff]  ;;  %v123_v32 = vld [vmem:[#allocation4 + $0x1e0] sm:$0xff]  ;;  %2147 = vmatpush1.bf16.msra.mxu1 %v2146_v28  ;;  %v89_v5 = vld [vmem:[#allocation4 + $0xd0] sm:$0xff] }
  0x43   :  { %v464_v25 = vld [vmem:[#allocation6 + $0x1c8] sm:$0xff]  ;;  %v2148_v30 = vpack.c.bf16 %v124_v24, %v120_v23  ;;  %v463_v33 = vld [vmem:[#allocation6 + $0x1c0] sm:$0xff]  ;;  %2209 = vmatprep.subr.bf16.mxu0 %v3074_v20  ;;  %v2150_v40 = vpack.c.bf16 %v123_v32, %v119_v31  ;;  %v93_v7 = vld [vmem:[#allocation4 + $0xf0] sm:$0xff] }
  0x44   :  { %v468_v27 = vld [vmem:[#allocation6 + $0x1e8] sm:$0xff]  ;;  %v467_v36 = vld [vmem:[#allocation6 + $0x1e0] sm:$0xff]  ;;  %2211 = vmatpush1.bf16.msra.mxu0 %v3077_v29  ;;  %v98_v8 = vld [vmem:[#allocation4 + $0x118] sm:$0xff]  ;;  %v2166_v12 = vpack.c.bf16 %v93_v7, %v89_v5 }
  0x45   :  { %v3080_v34 = vpack.c.bf16 %v468_v27, %v464_v25  ;;  %2149 = vmatprep.subr.bf16.mxu1 %v2148_v30  ;;  %v3083_v41 = vpack.c.bf16 %v467_v36, %v463_v33  ;;  %v3089_v48 = vld [vmem:[%s3744_s0] sm:$0xff]  ;;  %v3098_v56 = vld [vmem:[%s3744_s0 + $0x8] sm:$0xff]  ;;  %v102_v10 = vld [vmem:[#allocation4 + $0x138] sm:$0xff] }
  0x46   :  { %2151 = vmatpush1.bf16.msra.mxu1 %v2150_v40  ;;  %v3118_v11 = vld [vmem:[%s3744_s0 + $0x18] sm:$0xff]  ;;  %v2168_v14 = vpack.c.bf16 %v102_v10, %v98_v8  ;;  %v97_v16 = vld [vmem:[#allocation4 + $0x110] sm:$0xff]  ;;  %v3127_v21 = vld [vmem:[%s3744_s0 + $0x20] sm:$0xff] }
  0x47   :  { %2213 = vmatprep.subr.bf16.mxu0 %v3080_v34  ;;  %2153 = vmatprep.subr.bf16.mxu1 %v2152_v42  ;;  %v101_v17 = vld [vmem:[#allocation4 + $0x130] sm:$0xff]  ;;  %v106_v18 = vld [vmem:[#allocation4 + $0x158] sm:$0xff]  ;;  %v3136_v31 = vld [vmem:[%s3744_s0 + $0x28] sm:$0xff] }
  0x48   :  { %2215 = vmatpush1.bf16.msra.mxu0 %v3083_v41  ;;  %v110_v19 = vld [vmem:[#allocation4 + $0x178] sm:$0xff]  ;;  %v2170_v23 = vpack.c.bf16 %v101_v17, %v97_v16  ;;  %v105_v25 = vld [vmem:[#allocation4 + $0x150] sm:$0xff] }
  0x49   :  { %2249 = vmatprep.subr.bf16.mxu0 %v3039_v9  ;;  %214 = vmatmul.mubr.f32.vlgmr.msra.gmra.mrb[0].mxu1 %v3089_v48  ;;  %v2172_v24 = vpack.c.bf16 %v110_v19, %v106_v18  ;;  %v109_v27 = vld [vmem:[#allocation4 + $0x170] sm:$0xff]  ;;  %v114_v28 = vld [vmem:[#allocation4 + $0x198] sm:$0xff] }
  0x4a   :  { %2155 = vmatpush1.bf16.msra.mxu1 %v2154_v49  ;;  %219 = vmatprep.mubr.f32.mxu1 %v3753_v0  ;;  %v118_v30 = vld [vmem:[#allocation4 + $0x1b8] sm:$0xff]  ;;  %v2174_v32 = vpack.c.bf16 %v109_v27, %v105_v25  ;;  %v113_v36 = vld [vmem:[#allocation4 + $0x190] sm:$0xff] }
  0x4b   :  { %543 = vmatmul.mubr.f32.vlgmr.msra.gmra.mrb[0].mxu0 %v3753_v0  ;;  %2157 = vmatprep.subr.bf16.mxu1 %v2156_v50  ;;  %v2176_v33 = vpack.c.bf16 %v118_v30, %v114_v28  ;;  %v117_v37 = vld [vmem:[#allocation4 + $0x1b0] sm:$0xff]  ;;  %v122_v38 = vld [vmem:[#allocation4 + $0x1d8] sm:$0xff] }
  0x4c   :  { %2251 = vmatpush1.bf16.msra.mxu0 %v3041_v13  ;;  %720 = vmatprep.mubr.f32.mxu0 %v3753_v0  ;;  %v126_v40 = vld [vmem:[#allocation4 + $0x1f8] sm:$0xff]  ;;  %v3145_v42 = vld [vmem:[%s3744_s0 + $0x30] sm:$0xff]  ;;  %v2178_v43 = vpack.c.bf16 %v117_v37, %v113_v36 }
  0x4d   :  { %220 = vmatmul.mubr.f32.gmra.mrb[2].mxu1 %v3098_v56  ;;  %2253 = vmatprep.subr.bf16.mxu0 %v3045_v22  ;;  %v2180_v45 = vpack.c.bf16 %v126_v40, %v122_v38  ;;  %v121_v46 = vld [vmem:[#allocation4 + $0x1d0] sm:$0xff]  ;;  %v410_v49 = vld [vmem:[#allocation6 + $0x18] sm:$0xff] }
  0x4e   :  { %2159 = vmatpush1.bf16.msra.mxu1 %v2158_v58  ;;  %225 = vmatprep.mubr.f32.mxu1 %v3753_v0  ;;  %v125_v47 = vld [vmem:[#allocation4 + $0x1f0] sm:$0xff]  ;;  %v414_v50 = vld [vmem:[#allocation6 + $0x38] sm:$0xff] }
  0x4f   :  { %2161 = vmatprep.subr.bf16.mxu1 %v2160_v59  ;;  %v3154_v51 = vld [vmem:[%s3744_s0 + $0x38] sm:$0xff]  ;;  %v2182_v53 = vpack.c.bf16 %v125_v47, %v121_v46  ;;  %v3156_v54 = vpack.c.bf16 %v414_v50, %v410_v49  ;;  %v409_v55 = vld [vmem:[#allocation6 + $0x10] sm:$0xff] }
  0x50   :  { %2255 = vmatpush1.bf16.msra.mxu0 %v3047_v26  ;;  %v413_v58 = vld [vmem:[#allocation6 + $0x30] sm:$0xff]  ;;  %v418_v59 = vld [vmem:[#allocation6 + $0x58] sm:$0xff] }
  0x51   :  { %226 = vmatmul.mubr.f32.gmra.mrb[4].mxu1 %v3109_v2  ;;  %2257 = vmatprep.subr.bf16.mxu0 %v3050_v35  ;;  %v422_v60 = vld [vmem:[#allocation6 + $0x78] sm:$0xff]  ;;  %v3162_v61 = vpack.c.bf16 %v413_v58, %v409_v55  ;;  %v417_v63 = vld [vmem:[#allocation6 + $0x50] sm:$0xff] }
  0x52   :  { %2163 = vmatpush1.bf16.msra.mxu1 %v2162_v3  ;;  %231 = vmatprep.mubr.f32.mxu1 %v3753_v0  ;;  %v3165_v62 = vpack.c.bf16 %v422_v60, %v418_v59  ;;  %v421_v3 = vld [vmem:[#allocation6 + $0x70] sm:$0xff]  ;;  %v430_v5 = vld [vmem:[#allocation6 + $0xb8] sm:$0xff]  ;;  %v127_v59 = vld [vmem:[%s3747_s3] sm:$0xf] }
  0x53   :  { %2165 = vmatprep.subr.bf16.mxu1 %v2164_v4  ;;  %v426_v4 = vld [vmem:[#allocation6 + $0x98] sm:$0xff]  ;;  %v3172_v7 = vpack.c.bf16 %v421_v3, %v417_v63  ;;  %v425_v10 = vld [vmem:[#allocation6 + $0x90] sm:$0xff] }
  0x54   :  { %2259 = vmatpush1.bf16.msra.mxu0 %v3053_v39  ;;  %v3175_v8 = vpack.c.bf16 %v430_v5, %v426_v4  ;;  %v438_v16 = vld [vmem:[#allocation6 + $0xf8] sm:$0xff]  ;;  %v433_v18 = vld [vmem:[#allocation6 + $0xd0] sm:$0xff] }
  0x55   :  { %232 = vmatmul.mubr.f32.gmra.mrb[6].mxu1 %v3118_v11  ;;  %2261 = vmatprep.subr.bf16.mxu0 %v3056_v44  ;;  %v437_v19 = vld [vmem:[#allocation6 + $0xf0] sm:$0xff]  ;;  %v450_v30 = vld [vmem:[#allocation6 + $0x158] sm:$0xff] }
  0x56   :  { %2167 = vmatpush1.bf16.msra.mxu1 %v2166_v12  ;;  %237 = vmatprep.mubr.f32.mxu1 %v3753_v0  ;;  %v429_v12 = vld [vmem:[#allocation6 + $0xb0] sm:$0xff]  ;;  %v458_v38 = vld [vmem:[#allocation6 + $0x198] sm:$0xff] }
  0x57   :  { %2169 = vmatprep.subr.bf16.mxu1 %v2168_v14  ;;  %v434_v14 = vld [vmem:[#allocation6 + $0xd8] sm:$0xff]  ;;  %v441_v27 = vld [vmem:[#allocation6 + $0x110] sm:$0xff] }
  0x58   :  { %2263 = vmatpush1.bf16.msra.mxu0 %v3059_v52  ;;  %v3183_v17 = vpack.c.bf16 %v438_v16, %v434_v14  ;;  %v445_v28 = vld [vmem:[#allocation6 + $0x130] sm:$0xff]  ;;  %v462_v40 = vld [vmem:[#allocation6 + $0x1b8] sm:$0xff] }
  0x59   :  { %238 = vmatmul.mubr.f32.gmra.mrb[8].mxu1 %v3127_v21  ;;  %2265 = vmatprep.subr.bf16.mxu0 %v3062_v57  ;;  %v449_v36 = vld [vmem:[#allocation6 + $0x150] sm:$0xff]  ;;  %v466_v47 = vld [vmem:[#allocation6 + $0x1d8] sm:$0xff] }
  0x5a   :  { %2171 = vmatpush1.bf16.msra.mxu1 %v2170_v23  ;;  %243 = vmatprep.mubr.f32.mxu1 %v3753_v0  ;;  %v442_v23 = vld [vmem:[#allocation6 + $0x118] sm:$0xff]  ;;  %v453_v37 = vld [vmem:[#allocation6 + $0x170] sm:$0xff] }
  0x5b   :  { %2173 = vmatprep.subr.bf16.mxu1 %v2172_v24  ;;  %v446_v24 = vld [vmem:[#allocation6 + $0x138] sm:$0xff]  ;;  %v461_v46 = vld [vmem:[#allocation6 + $0x1b0] sm:$0xff] }
  0x5c   :  { %2267 = vmatpush1.bf16.msra.mxu0 %v3065_v1  ;;  %v3191_v25 = vpack.c.bf16 %v446_v24, %v442_v23  ;;  %v470_v49 = vld [vmem:[#allocation6 + $0x1f8] sm:$0xff]  ;;  %v469_v55 = vld [vmem:[#allocation6 + $0x1f0] sm:$0xff] }
  0x5d   :  { %244 = vmatmul.mubr.f32.gmra.mrb[10].mxu1 %v3136_v31  ;;  %2269 = vmatprep.subr.bf16.mxu0 %v3068_v6  ;;  %v3215_v50 = vpack.c.bf16 %v470_v49, %v466_v47 }
  0x5e   :  { %2175 = vmatpush1.bf16.msra.mxu1 %v2174_v32  ;;  %249 = vmatprep.mubr.f32.mxu1 %v3753_v0  ;;  %v454_v32 = vld [vmem:[#allocation6 + $0x178] sm:$0xff] }
  0x5f   :  { %2177 = vmatprep.subr.bf16.mxu1 %v2176_v33  ;;  %v3199_v33 = vpack.c.bf16 %v454_v32, %v450_v30 }
  0x60   :  { %2271 = vmatpush1.bf16.msra.mxu0 %v3071_v15 }
  0x61   :  { %250 = vmatmul.mubr.f32.gmra.mrb[12].mxu1 %v3145_v42  ;;  %2273 = vmatprep.subr.bf16.mxu0 %v3074_v20 }
  0x62   :  { %2179 = vmatpush1.bf16.msra.mxu1 %v2178_v43  ;;  %255 = vmatprep.mubr.f32.mxu1 %v3753_v0  ;;  %v3207_v43 = vpack.c.bf16 %v462_v40, %v458_v38 }
  0x63   :  { %2181 = vmatprep.subr.bf16.mxu1 %v2180_v45  ;;  %v457_v45 = vld [vmem:[#allocation6 + $0x190] sm:$0xff] }
  0x64   :  { %2275 = vmatpush1.bf16.msra.mxu0 %v3077_v29 }
  0x65   :  { %256 = vmatmul.mubr.f32.gmra.mrb[14].mxu1 %v3154_v51  ;;  %2277 = vmatprep.subr.bf16.mxu0 %v3080_v34 }
  0x66   :  { %2183 = vmatpush1.bf16.msra.mxu1 %v2182_v53  ;;  %326 = vmatprep.mubr.f32.mxu1 %v3753_v0  ;;  %v465_v53 = vld [vmem:[#allocation6 + $0x1d0] sm:$0xff] }
  0x67   :  { %2217 = vmatprep.subr.bf16.mxu1 %v3156_v54  ;;  %v3220_v58 = vpack.c.bf16 %v469_v55, %v465_v53 }
  0x68   :  { %2279 = vmatpush1.bf16.msra.mxu0 %v3083_v41 }
  0x69   :  { %327 = vmatmul.mubr.f32.vlgmr.msra.gmra.mrb[16].mxu1 %v3089_v48  ;;  %2313 = vmatprep.subr.bf16.mxu0 %v3039_v9  ;;  %v3180_v48 = vpack.c.bf16 %v429_v12, %v425_v10 }
  0x6a   :  { %2219 = vmatpush1.bf16.msra.mxu1 %v3162_v61  ;;  %332 = vmatprep.mubr.f32.mxu1 %v3753_v0 }
  0x6b   :  { %2221 = vmatprep.subr.bf16.mxu1 %v3165_v62 }
  0x6d   :  { %333 = vmatmul.mubr.f32.gmra.mrb[18].mxu1 %v3098_v56  ;;  %v3188_v56 = vpack.c.bf16 %v437_v19, %v433_v18 }
  0x6e   :  { %2223 = vmatpush1.bf16.msra.mxu1 %v3172_v7  ;;  %338 = vmatprep.mubr.f32.mxu1 %v3753_v0 }
  0x6f   :  { %2225 = vmatprep.subr.bf16.mxu1 %v3175_v8 }
  0x71   :  { %339 = vmatmul.mubr.f32.gmra.mrb[20].mxu1 %v3109_v2  ;;  %v3196_v2 = vpack.c.bf16 %v445_v28, %v441_v27 }
  0x72   :  { %2227 = vmatpush1.bf16.msra.mxu1 %v3180_v48  ;;  %344 = vmatprep.mubr.f32.mxu1 %v3753_v0 }
  0x73   :  { %2229 = vmatprep.subr.bf16.mxu1 %v3183_v17 }
  0x75   :  { %345 = vmatmul.mubr.f32.gmra.mrb[22].mxu1 %v3118_v11  ;;  %v3204_v11 = vpack.c.bf16 %v453_v37, %v449_v36 }
  0x76   :  { %2231 = vmatpush1.bf16.msra.mxu1 %v3188_v56  ;;  %350 = vmatprep.mubr.f32.mxu1 %v3753_v0 }
  0x77   :  { %2233 = vmatprep.subr.bf16.mxu1 %v3191_v25 }
  0x79   :  { %351 = vmatmul.mubr.f32.gmra.mrb[24].mxu1 %v3127_v21  ;;  %v3212_v21 = vpack.c.bf16 %v461_v46, %v457_v45 }
  0x7a   :  { %2235 = vmatpush1.bf16.msra.mxu1 %v3196_v2  ;;  %356 = vmatprep.mubr.f32.mxu1 %v3753_v0 }
  0x7b   :  { %2237 = vmatprep.subr.bf16.mxu1 %v3199_v33 }
  0x7d   :  { %357 = vmatmul.mubr.f32.gmra.mrb[26].mxu1 %v3136_v31  ;;  %v129_v31 = vlaneseq }
  0x7e   :  { %2239 = vmatpush1.bf16.msra.mxu1 %v3204_v11  ;;  %362 = vmatprep.mubr.f32.mxu1 %v3753_v0 }
  0x7f   :  { %2241 = vmatprep.subr.bf16.mxu1 %v3207_v43 }
  0x81   :  { %363 = vmatmul.mubr.f32.gmra.mrb[28].mxu1 %v3145_v42  ;;  %v3245_v42 = vshrl.u32 %v129_v31, 7 }
  0x82   :  { %2243 = vmatpush1.bf16.msra.mxu1 %v3212_v21  ;;  %368 = vmatprep.mubr.f32.mxu1 %v3753_v0 }
  0x83   :  { %2245 = vmatprep.subr.bf16.mxu1 %v3215_v50  ;;  %3757 = vst [vmem:[#allocation10_spill] sm:$0xff] %v3245_v42  ;;  %v3751_v60 = vsub.s32 1, %v3245_v42 }
  0x85   :  { %369 = vmatmul.mubr.f32.gmra.mrb[30].mxu1 %v3154_v51  ;;  %v3752_v51 = vsub.s32 0, %v3245_v42  ;;  %v136_v3 = vrot.slane %v127_v59, %v3751_v60 }
  0x86   :  { %2247 = vmatpush1.bf16.msra.mxu1 %v3220_v58  ;;  %613 = vmatprep.mubr.f32.mxu1 %v3753_v0 }
  0x87   :  { %2281 = vmatprep.subr.bf16.mxu1 %v3156_v54  ;;  %v132_v63 = vrot.slane %v127_v59, %v3752_v51 }
  0x89   :  { %614 = vmatmul.mubr.f32.vlgmr.msra.gmra.mrb[16].mxu1 %v3753_v0 }
  0x8a   :  { %2283 = vmatpush1.bf16.msra.mxu1 %v3162_v61  ;;  %791 = vmatprep.mubr.f32.mxu1 %v3753_v0 }
  0x8b   :  { %2285 = vmatprep.subr.bf16.mxu1 %v3165_v62 }
  0x8e   :  { %2287 = vmatpush1.bf16.msra.mxu1 %v3172_v7 }
  0x8f   :  { %2289 = vmatprep.subr.bf16.mxu1 %v3175_v8 }
  0x92   :  { %2291 = vmatpush1.bf16.msra.mxu1 %v3180_v48 }
  0x93   :  { %2293 = vmatprep.subr.bf16.mxu1 %v3183_v17 }
  0x96   :  { %2295 = vmatpush1.bf16.msra.mxu1 %v3188_v56 }
  0x97   :  { %2297 = vmatprep.subr.bf16.mxu1 %v3191_v25 }
  0x9a   :  { %2299 = vmatpush1.bf16.msra.mxu1 %v3196_v2 }
  0x9b   :  { %2301 = vmatprep.subr.bf16.mxu1 %v3199_v33 }
  0x9e   :  { %2303 = vmatpush1.bf16.msra.mxu1 %v3204_v11 }
  0x9f   :  { %2305 = vmatprep.subr.bf16.mxu1 %v3207_v43 }
  0xa2   :  { %2307 = vmatpush1.bf16.msra.mxu1 %v3212_v21 }
  0xa3   :  { %2309 = vmatprep.subr.bf16.mxu1 %v3215_v50 }
  0xa6   :  { %2311 = vmatpush1.bf16.msra.mxu1 %v3220_v58 }
  0xa7   :  { %2345 = vmatprep.subr.bf16.mxu1 %v3156_v54 }
 0x11c   :  { %v215_v4 = vpop.f32.mrb[0].mxu1 }
 0x11d   :  { %v216_v5 = vadd.f32 %v215_v4, %v132_v63  ;;  %v217_v10 = vpop.f32.mrb[1].mxu1 }
 0x11e   :  { %v544_v12 = vpop.f32.mrb[0].mxu0  ;;  %v218_v14 = vadd.f32 %v217_v10, %v136_v3 }
 0x11f   :  { %v546_v16 = vpop.f32.mrb[1].mxu0  ;;  %v620_v18 = vadd.f32 %v544_v12, %v216_v5 }
 0x120   :  { %v621_v19 = vadd.f32 %v546_v16, %v218_v14  ;;  %v221_v23 = vpop.f32.mrb[2].mxu1 }
 0x121   :  { %v3256_v24 = vadd.f32 %v221_v23, %v132_v63  ;;  %v223_v27 = vpop.f32.mrb[3].mxu1 }
 0x122   :  { %v3258_v28 = vadd.f32 %v223_v27, %v136_v3 }
 0x124   :  { %v227_v30 = vpop.f32.mrb[4].mxu1 }
 0x125   :  { %v3260_v32 = vadd.f32 %v227_v30, %v132_v63  ;;  %v229_v36 = vpop.f32.mrb[5].mxu1 }
 0x126   :  { %v3262_v37 = vadd.f32 %v229_v36, %v136_v3 }
 0x128   :  { %v233_v38 = vpop.f32.mrb[6].mxu1 }
 0x129   :  { %v3264_v40 = vadd.f32 %v233_v38, %v132_v63  ;;  %v235_v45 = vpop.f32.mrb[7].mxu1 }
 0x12a   :  { %v3266_v46 = vadd.f32 %v235_v45, %v136_v3  ;;  %v2097_v45 = vmul.f32 -1.442695, %v621_v19 }
 0x12c   :  { %v239_v47 = vpop.f32.mrb[8].mxu1  ;;  %2797 = vpow2.f32 %v2097_v45 }
 0x12d   :  { %v3268_v49 = vadd.f32 %v239_v47, %v132_v63  ;;  %v241_v53 = vpop.f32.mrb[9].mxu1  ;;  %v2096_v47 = vmul.f32 -1.442695, %v620_v18 }
 0x12e   :  { %v3270_v55 = vadd.f32 %v241_v53, %v136_v3  ;;  %v139_v53 = vsub.s32 2, %v3245_v42 }
 0x12f   :  { %2799 = vpow2.f32 %v2096_v47 }
 0x130   :  { %v245_v31 = vpop.f32.mrb[10].mxu1  ;;  %v3286_v51 = vrot.slane %v127_v59, %v139_v53 }
 0x131   :  { %v3272_v4 = vadd.f32 %v245_v31, %v132_v63  ;;  %v247_v5 = vpop.f32.mrb[11].mxu1 }
 0x132   :  { %v3274_v10 = vadd.f32 %v247_v5, %v136_v3  ;;  %v143_v5 = vsub.s32 3, %v3245_v42 }
 0x134   :  { %v251_v12 = vpop.f32.mrb[12].mxu1  ;;  %v3288_v0 = vrot.slane %v127_v59, %v143_v5 }
 0x135   :  { %v3276_v14 = vadd.f32 %v251_v12, %v132_v63  ;;  %v253_v16 = vpop.f32.mrb[13].mxu1 }
 0x136   :  { %v3278_v23 = vadd.f32 %v253_v16, %v136_v3  ;;  %v2798_v31 = vpop.eup %2797 }
 0x137   :  { %v633_v60 = vadd.f32 1.0, %v2798_v31 }
 0x138   :  { %v257_v27 = vpop.f32.mrb[14].mxu1 }
 0x139   :  { %v3280_v30 = vadd.f32 %v257_v27, %v132_v63  ;;  %v259_v36 = vpop.f32.mrb[15].mxu1  ;;  %v2800_v12 = vpop.eup %2799  ;;  %2801 = vrcp.f32 %v633_v60 }
 0x13a   :  { %v3282_v38 = vadd.f32 %v259_v36, %v136_v3  ;;  %v627_v16 = vadd.f32 1.0, %v2800_v12 }
 0x13b   :  { %3758 = vst [vmem:[#allocation11_spill] sm:$0xff] %v3280_v30 }
 0x13c   :  { %3759 = vst [vmem:[#allocation12_spill] sm:$0xff] %v3282_v38  ;;  %2803 = vrcp.f32 %v627_v16 }
 0x143   :  { %v2802_v36 = vpop.eup %2801 }
 0x144   :  { %v643_v31 = vmul.f32 0.0, %v2802_v36 }
 0x146   :  { %v2804_v45 = vpop.eup %2803 }
 0x15c   :  { %v615_v63 = vpop.f32.mrb[16].mxu1 }
 0x15d   :  { %v2760_v3 = vadd.f32 %v615_v63, %v3286_v51  ;;  %v617_v19 = vpop.f32.mrb[17].mxu1 }
 0x15e   :  { %v2761_v18 = vadd.f32 %v617_v19, %v3288_v0 }
 0x15f   :  { %2805 = vtanh.f32 %v2760_v3 }
 0x160   :  { %v2098_v27 = vmul.f32 -1.442695, %v2761_v18 }
 0x162   :  { %2807 = vpow2.f32 %v2098_v27 }
 0x169   :  { %v2806_v47 = vpop.eup %2805 }
 0x16a   :  { %v644_v53 = vmul.f32 %v2806_v47, %v2804_v45 }
 0x16c   :  { %v2808_v42 = vpop.eup %2807  ;;  %v3292_v12 = vadd.f32 %v644_v53, %v643_v31 }
 0x16d   :  { %v640_v59 = vadd.f32 1.0, %v2808_v42  ;;  %v3760_v42 = vmov 0.0  }
 0x16e   :  { %2809 = vtanh.f32 %v3292_v12 }
 0x16f   :  { %2811 = vrcp.f32 %v640_v59 }
 0x178   :  { %v2810_v60 = vpop.eup %2809 }
 0x179   :  { %v2812_v5 = vpop.eup %2811 }
 0x17a   :  { %v3295_v16 = vmul.f32 %v2812_v5, %v2810_v60 }
 0x17c   :  { %721 = vmatmul.mubr.f32.vlgmr.msra.gmra.mrb[2].mxu0 %v3295_v16  ;;  %792 = vmatmul.mubr.f32.vlgmr.msra.gmra.mrb[18].mxu1 %v3295_v16 }
 0x17d   :  { %2315 = vmatpush1.bf16.msra.mxu0 %v3041_v13  ;;  %2347 = vmatpush1.bf16.msra.mxu1 %v3162_v61 }
 0x17e   :  { %2317 = vmatprep.subr.bf16.mxu0 %v3045_v22  ;;  %2349 = vmatprep.subr.bf16.mxu1 %v3165_v62 }
 0x17f   :  { %899 = vmatprep.mubr.f32.mxu0 %v3760_v42  ;;  %970 = vmatprep.mubr.f32.mxu1 %v3760_v42 }
 0x181   :  { %2319 = vmatpush1.bf16.msra.mxu0 %v3047_v26  ;;  %2351 = vmatpush1.bf16.msra.mxu1 %v3172_v7 }
 0x182   :  { %2321 = vmatprep.subr.bf16.mxu0 %v3050_v35  ;;  %2353 = vmatprep.subr.bf16.mxu1 %v3175_v8 }
 0x185   :  { %2323 = vmatpush1.bf16.msra.mxu0 %v3053_v39  ;;  %2355 = vmatpush1.bf16.msra.mxu1 %v3180_v48 }
 0x186   :  { %2325 = vmatprep.subr.bf16.mxu0 %v3056_v44  ;;  %2357 = vmatprep.subr.bf16.mxu1 %v3183_v17 }
 0x189   :  { %2327 = vmatpush1.bf16.msra.mxu0 %v3059_v52  ;;  %2359 = vmatpush1.bf16.msra.mxu1 %v3188_v56 }
 0x18a   :  { %2329 = vmatprep.subr.bf16.mxu0 %v3062_v57  ;;  %2361 = vmatprep.subr.bf16.mxu1 %v3191_v25 }
 0x18d   :  { %2331 = vmatpush1.bf16.msra.mxu0 %v3065_v1  ;;  %2363 = vmatpush1.bf16.msra.mxu1 %v3196_v2 }
 0x18e   :  { %2333 = vmatprep.subr.bf16.mxu0 %v3068_v6  ;;  %2365 = vmatprep.subr.bf16.mxu1 %v3199_v33 }
 0x191   :  { %2335 = vmatpush1.bf16.msra.mxu0 %v3071_v15  ;;  %2367 = vmatpush1.bf16.msra.mxu1 %v3204_v11 }
 0x192   :  { %2337 = vmatprep.subr.bf16.mxu0 %v3074_v20  ;;  %2369 = vmatprep.subr.bf16.mxu1 %v3207_v43 }
 0x195   :  { %2339 = vmatpush1.bf16.msra.mxu0 %v3077_v29  ;;  %2371 = vmatpush1.bf16.msra.mxu1 %v3212_v21 }
 0x196   :  { %2341 = vmatprep.subr.bf16.mxu0 %v3080_v34  ;;  %2373 = vmatprep.subr.bf16.mxu1 %v3215_v50 }
 0x199   :  { %2343 = vmatpush1.bf16.msra.mxu0 %v3083_v41  ;;  %2375 = vmatpush1.bf16.msra.mxu1 %v3220_v58 }
 0x19a   :  { %2377 = vmatprep.subr.bf16.mxu0 %v3039_v9  ;;  %2409 = vmatprep.subr.bf16.mxu1 %v3156_v54 }
 0x24f   :  { %v722_v63 = vpop.f32.mrb[2].mxu0  ;;  %v793_v3 = vpop.f32.mrb[18].mxu1 }
 0x250   :  { %v798_v19 = vadd.f32 %v722_v63, %v3256_v24  ;;  %v724_v18 = vpop.f32.mrb[3].mxu0  ;;  %v795_v27 = vpop.f32.mrb[19].mxu1  ;;  %v2762_v59 = vadd.f32 %v793_v3, %v3286_v51 }
 0x251   :  { %v799_v36 = vadd.f32 %v724_v18, %v3258_v28  ;;  %v2763_v31 = vadd.f32 %v795_v27, %v3288_v0 }
 0x252   :  { %v2099_v45 = vmul.f32 -1.442695, %v798_v19 }
 0x253   :  { %v2100_v47 = vmul.f32 -1.442695, %v799_v36  ;;  %v2101_v53 = vmul.f32 -1.442695, %v2763_v31 }
 0x254   :  { %2813 = vpow2.f32 %v2099_v45 }
 0x255   :  { %2815 = vpow2.f32 %v2100_v47 }
 0x256   :  { %2817 = vpow2.f32 %v2101_v53 }
 0x257   :  { %2819 = vtanh.f32 %v2762_v59 }
 0x25e   :  { %v2814_v60 = vpop.eup %2813 }
 0x25f   :  { %v2816_v5 = vpop.eup %2815  ;;  %v805_v38 = vadd.f32 1.0, %v2814_v60 }
 0x260   :  { %v811_v30 = vadd.f32 1.0, %v2816_v5  ;;  %v2818_v24 = vpop.eup %2817 }
 0x261   :  { %2821 = vrcp.f32 %v805_v38  ;;  %v2820_v63 = vpop.eup %2819  ;;  %v818_v36 = vadd.f32 1.0, %v2818_v24 }
 0x262   :  { %2823 = vrcp.f32 %v811_v30 }
 0x263   :  { %2825 = vrcp.f32 %v818_v36 }
 0x26b   :  { %v2822_v28 = vpop.eup %2821 }
 0x26c   :  { %v2824_v19 = vpop.eup %2823  ;;  %v822_v18 = vmul.f32 %v2822_v28, %v2820_v63 }
 0x26d   :  { %v821_v45 = vmul.f32 %v2824_v19, %v3292_v12  ;;  %v2826_v3 = vpop.eup %2825 }
 0x26f   :  { %v3338_v27 = vadd.f32 %v822_v18, %v821_v45 }
 0x271   :  { %2827 = vtanh.f32 %v3338_v27 }
 0x27b   :  { %v2828_v47 = vpop.eup %2827 }
 0x27c   :  { %v3341_v31 = vmul.f32 %v2828_v47, %v2826_v3 }
 0x27e   :  { %900 = vmatmul.mubr.f32.vlgmr.msra.gmra.mrb[4].mxu0 %v3341_v31  ;;  %971 = vmatmul.mubr.f32.vlgmr.msra.gmra.mrb[20].mxu1 %v3341_v31 }
 0x27f   :  { %2379 = vmatpush1.bf16.msra.mxu0 %v3041_v13  ;;  %2411 = vmatpush1.bf16.msra.mxu1 %v3162_v61 }
 0x280   :  { %2381 = vmatprep.subr.bf16.mxu0 %v3045_v22  ;;  %2413 = vmatprep.subr.bf16.mxu1 %v3165_v62 }
 0x281   :  { %1078 = vmatprep.mubr.f32.mxu0 %v3760_v42  ;;  %1149 = vmatprep.mubr.f32.mxu1 %v3760_v42 }
 0x283   :  { %2383 = vmatpush1.bf16.msra.mxu0 %v3047_v26  ;;  %2415 = vmatpush1.bf16.msra.mxu1 %v3172_v7 }
 0x284   :  { %2385 = vmatprep.subr.bf16.mxu0 %v3050_v35  ;;  %2417 = vmatprep.subr.bf16.mxu1 %v3175_v8 }
 0x287   :  { %2387 = vmatpush1.bf16.msra.mxu0 %v3053_v39  ;;  %2419 = vmatpush1.bf16.msra.mxu1 %v3180_v48 }
 0x288   :  { %2389 = vmatprep.subr.bf16.mxu0 %v3056_v44  ;;  %2421 = vmatprep.subr.bf16.mxu1 %v3183_v17 }
 0x28b   :  { %2391 = vmatpush1.bf16.msra.mxu0 %v3059_v52  ;;  %2423 = vmatpush1.bf16.msra.mxu1 %v3188_v56 }
 0x28c   :  { %2393 = vmatprep.subr.bf16.mxu0 %v3062_v57  ;;  %2425 = vmatprep.subr.bf16.mxu1 %v3191_v25 }
 0x28f   :  { %2395 = vmatpush1.bf16.msra.mxu0 %v3065_v1  ;;  %2427 = vmatpush1.bf16.msra.mxu1 %v3196_v2 }
 0x290   :  { %2397 = vmatprep.subr.bf16.mxu0 %v3068_v6  ;;  %2429 = vmatprep.subr.bf16.mxu1 %v3199_v33 }
 0x293   :  { %2399 = vmatpush1.bf16.msra.mxu0 %v3071_v15  ;;  %2431 = vmatpush1.bf16.msra.mxu1 %v3204_v11 }
 0x294   :  { %2401 = vmatprep.subr.bf16.mxu0 %v3074_v20  ;;  %2433 = vmatprep.subr.bf16.mxu1 %v3207_v43 }
 0x297   :  { %2403 = vmatpush1.bf16.msra.mxu0 %v3077_v29  ;;  %2435 = vmatpush1.bf16.msra.mxu1 %v3212_v21 }
 0x298   :  { %2405 = vmatprep.subr.bf16.mxu0 %v3080_v34  ;;  %2437 = vmatprep.subr.bf16.mxu1 %v3215_v50 }
 0x29b   :  { %2407 = vmatpush1.bf16.msra.mxu0 %v3083_v41  ;;  %2439 = vmatpush1.bf16.msra.mxu1 %v3220_v58 }
 0x29c   :  { %2441 = vmatprep.subr.bf16.mxu0 %v3039_v9  ;;  %2473 = vmatprep.subr.bf16.mxu1 %v3156_v54 }
 0x351   :  { %v901_v30 = vpop.f32.mrb[4].mxu0  ;;  %v972_v38 = vpop.f32.mrb[20].mxu1 }
 0x352   :  { %v977_v12 = vadd.f32 %v901_v30, %v3260_v32  ;;  %v903_v53 = vpop.f32.mrb[5].mxu0  ;;  %v974_v59 = vpop.f32.mrb[21].mxu1  ;;  %v2764_v19 = vadd.f32 %v972_v38, %v3286_v51 }
 0x353   :  { %v978_v60 = vadd.f32 %v903_v53, %v3262_v37  ;;  %v2765_v63 = vadd.f32 %v974_v59, %v3288_v0 }
 0x354   :  { %v2102_v5 = vmul.f32 -1.442695, %v977_v12 }
 0x355   :  { %v2103_v24 = vmul.f32 -1.442695, %v978_v60  ;;  %v2104_v28 = vmul.f32 -1.442695, %v2765_v63 }
 0x356   :  { %2829 = vpow2.f32 %v2102_v5 }
 0x357   :  { %2831 = vpow2.f32 %v2103_v24 }
 0x358   :  { %2833 = vpow2.f32 %v2104_v28 }
 0x359   :  { %2835 = vtanh.f32 %v2764_v19 }
 0x360   :  { %v2830_v18 = vpop.eup %2829 }
 0x361   :  { %v2832_v36 = vpop.eup %2831  ;;  %v984_v45 = vadd.f32 1.0, %v2830_v18 }
 0x362   :  { %v990_v3 = vadd.f32 1.0, %v2832_v36  ;;  %v2834_v32 = vpop.eup %2833 }
 0x363   :  { %2837 = vrcp.f32 %v984_v45  ;;  %v2836_v47 = vpop.eup %2835  ;;  %v997_v53 = vadd.f32 1.0, %v2834_v32 }
 0x364   :  { %2839 = vrcp.f32 %v990_v3 }
 0x365   :  { %2841 = vrcp.f32 %v997_v53 }
 0x36d   :  { %v2838_v37 = vpop.eup %2837 }
 0x36e   :  { %v2840_v30 = vpop.eup %2839  ;;  %v1001_v12 = vmul.f32 %v2838_v37, %v2836_v47 }
 0x36f   :  { %v1000_v60 = vmul.f32 %v2840_v30, %v3338_v27  ;;  %v2842_v38 = vpop.eup %2841 }
 0x371   :  { %v3384_v59 = vadd.f32 %v1001_v12, %v1000_v60 }
 0x373   :  { %2843 = vtanh.f32 %v3384_v59 }
 0x37d   :  { %v2844_v5 = vpop.eup %2843 }
 0x37e   :  { %v3387_v24 = vmul.f32 %v2844_v5, %v2842_v38 }
 0x380   :  { %1079 = vmatmul.mubr.f32.vlgmr.msra.gmra.mrb[6].mxu0 %v3387_v24  ;;  %1150 = vmatmul.mubr.f32.vlgmr.msra.gmra.mrb[22].mxu1 %v3387_v24 }
 0x381   :  { %2443 = vmatpush1.bf16.msra.mxu0 %v3041_v13  ;;  %2475 = vmatpush1.bf16.msra.mxu1 %v3162_v61 }
 0x382   :  { %2445 = vmatprep.subr.bf16.mxu0 %v3045_v22  ;;  %2477 = vmatprep.subr.bf16.mxu1 %v3165_v62 }
 0x383   :  { %1257 = vmatprep.mubr.f32.mxu0 %v3760_v42  ;;  %1328 = vmatprep.mubr.f32.mxu1 %v3760_v42 }
 0x385   :  { %2447 = vmatpush1.bf16.msra.mxu0 %v3047_v26  ;;  %2479 = vmatpush1.bf16.msra.mxu1 %v3172_v7 }
 0x386   :  { %2449 = vmatprep.subr.bf16.mxu0 %v3050_v35  ;;  %2481 = vmatprep.subr.bf16.mxu1 %v3175_v8 }
 0x389   :  { %2451 = vmatpush1.bf16.msra.mxu0 %v3053_v39  ;;  %2483 = vmatpush1.bf16.msra.mxu1 %v3180_v48 }
 0x38a   :  { %2453 = vmatprep.subr.bf16.mxu0 %v3056_v44  ;;  %2485 = vmatprep.subr.bf16.mxu1 %v3183_v17 }
 0x38d   :  { %2455 = vmatpush1.bf16.msra.mxu0 %v3059_v52  ;;  %2487 = vmatpush1.bf16.msra.mxu1 %v3188_v56 }
 0x38e   :  { %2457 = vmatprep.subr.bf16.mxu0 %v3062_v57  ;;  %2489 = vmatprep.subr.bf16.mxu1 %v3191_v25 }
 0x391   :  { %2459 = vmatpush1.bf16.msra.mxu0 %v3065_v1  ;;  %2491 = vmatpush1.bf16.msra.mxu1 %v3196_v2 }
 0x392   :  { %2461 = vmatprep.subr.bf16.mxu0 %v3068_v6  ;;  %2493 = vmatprep.subr.bf16.mxu1 %v3199_v33 }
 0x395   :  { %2463 = vmatpush1.bf16.msra.mxu0 %v3071_v15  ;;  %2495 = vmatpush1.bf16.msra.mxu1 %v3204_v11 }
 0x396   :  { %2465 = vmatprep.subr.bf16.mxu0 %v3074_v20  ;;  %2497 = vmatprep.subr.bf16.mxu1 %v3207_v43 }
 0x399   :  { %2467 = vmatpush1.bf16.msra.mxu0 %v3077_v29  ;;  %2499 = vmatpush1.bf16.msra.mxu1 %v3212_v21 }
 0x39a   :  { %2469 = vmatprep.subr.bf16.mxu0 %v3080_v34  ;;  %2501 = vmatprep.subr.bf16.mxu1 %v3215_v50 }
 0x39d   :  { %2471 = vmatpush1.bf16.msra.mxu0 %v3083_v41  ;;  %2503 = vmatpush1.bf16.msra.mxu1 %v3220_v58 }
 0x39e   :  { %2505 = vmatprep.subr.bf16.mxu0 %v3039_v9  ;;  %2537 = vmatprep.subr.bf16.mxu1 %v3156_v54 }
 0x453   :  { %v1080_v27 = vpop.f32.mrb[6].mxu0  ;;  %v1151_v63 = vpop.f32.mrb[22].mxu1 }
 0x454   :  { %v1156_v28 = vadd.f32 %v1080_v27, %v3264_v40  ;;  %v1082_v19 = vpop.f32.mrb[7].mxu0  ;;  %v1153_v18 = vpop.f32.mrb[23].mxu1  ;;  %v2766_v37 = vadd.f32 %v1151_v63, %v3286_v51 }
 0x455   :  { %v1157_v36 = vadd.f32 %v1082_v19, %v3266_v46  ;;  %v2767_v32 = vadd.f32 %v1153_v18, %v3288_v0 }
 0x456   :  { %v2105_v45 = vmul.f32 -1.442695, %v1156_v28 }
 0x457   :  { %v2106_v3 = vmul.f32 -1.442695, %v1157_v36  ;;  %v2107_v47 = vmul.f32 -1.442695, %v2767_v32 }
 0x458   :  { %2845 = vpow2.f32 %v2105_v45 }
 0x459   :  { %2847 = vpow2.f32 %v2106_v3 }
 0x45a   :  { %2849 = vpow2.f32 %v2107_v47 }
 0x45b   :  { %2851 = vtanh.f32 %v2766_v37 }
 0x462   :  { %v2846_v30 = vpop.eup %2845 }
 0x463   :  { %v2848_v12 = vpop.eup %2847  ;;  %v1163_v53 = vadd.f32 1.0, %v2846_v30 }
 0x464   :  { %v1169_v60 = vadd.f32 1.0, %v2848_v12  ;;  %v2850_v40 = vpop.eup %2849 }
 0x465   :  { %2853 = vrcp.f32 %v1163_v53  ;;  %v2852_v38 = vpop.eup %2851  ;;  %v1176_v28 = vadd.f32 1.0, %v2850_v40 }
 0x466   :  { %2855 = vrcp.f32 %v1169_v60 }
 0x467   :  { %2857 = vrcp.f32 %v1176_v28 }
 0x46f   :  { %v2854_v46 = vpop.eup %2853 }
 0x470   :  { %v2856_v5 = vpop.eup %2855  ;;  %v1180_v27 = vmul.f32 %v2854_v46, %v2852_v38 }
 0x471   :  { %v1179_v19 = vmul.f32 %v2856_v5, %v3384_v59  ;;  %v2858_v63 = vpop.eup %2857 }
 0x473   :  { %v3430_v18 = vadd.f32 %v1180_v27, %v1179_v19 }
 0x475   :  { %2859 = vtanh.f32 %v3430_v18 }
 0x47f   :  { %v2860_v36 = vpop.eup %2859 }
 0x480   :  { %v3433_v45 = vmul.f32 %v2860_v36, %v2858_v63 }
 0x482   :  { %1258 = vmatmul.mubr.f32.vlgmr.msra.gmra.mrb[8].mxu0 %v3433_v45  ;;  %1329 = vmatmul.mubr.f32.vlgmr.msra.gmra.mrb[24].mxu1 %v3433_v45 }
 0x483   :  { %2507 = vmatpush1.bf16.msra.mxu0 %v3041_v13  ;;  %2539 = vmatpush1.bf16.msra.mxu1 %v3162_v61 }
 0x484   :  { %2509 = vmatprep.subr.bf16.mxu0 %v3045_v22  ;;  %2541 = vmatprep.subr.bf16.mxu1 %v3165_v62 }
 0x485   :  { %1436 = vmatprep.mubr.f32.mxu0 %v3760_v42  ;;  %1507 = vmatprep.mubr.f32.mxu1 %v3760_v42 }
 0x487   :  { %2511 = vmatpush1.bf16.msra.mxu0 %v3047_v26  ;;  %2543 = vmatpush1.bf16.msra.mxu1 %v3172_v7 }
 0x488   :  { %2513 = vmatprep.subr.bf16.mxu0 %v3050_v35  ;;  %2545 = vmatprep.subr.bf16.mxu1 %v3175_v8 }
 0x48b   :  { %2515 = vmatpush1.bf16.msra.mxu0 %v3053_v39  ;;  %2547 = vmatpush1.bf16.msra.mxu1 %v3180_v48 }
 0x48c   :  { %2517 = vmatprep.subr.bf16.mxu0 %v3056_v44  ;;  %2549 = vmatprep.subr.bf16.mxu1 %v3183_v17 }
 0x48f   :  { %2519 = vmatpush1.bf16.msra.mxu0 %v3059_v52  ;;  %2551 = vmatpush1.bf16.msra.mxu1 %v3188_v56 }
 0x490   :  { %2521 = vmatprep.subr.bf16.mxu0 %v3062_v57  ;;  %2553 = vmatprep.subr.bf16.mxu1 %v3191_v25 }
 0x493   :  { %2523 = vmatpush1.bf16.msra.mxu0 %v3065_v1  ;;  %2555 = vmatpush1.bf16.msra.mxu1 %v3196_v2 }
 0x494   :  { %2525 = vmatprep.subr.bf16.mxu0 %v3068_v6  ;;  %2557 = vmatprep.subr.bf16.mxu1 %v3199_v33 }
 0x497   :  { %2527 = vmatpush1.bf16.msra.mxu0 %v3071_v15  ;;  %2559 = vmatpush1.bf16.msra.mxu1 %v3204_v11 }
 0x498   :  { %2529 = vmatprep.subr.bf16.mxu0 %v3074_v20  ;;  %2561 = vmatprep.subr.bf16.mxu1 %v3207_v43 }
 0x49b   :  { %2531 = vmatpush1.bf16.msra.mxu0 %v3077_v29  ;;  %2563 = vmatpush1.bf16.msra.mxu1 %v3212_v21 }
 0x49c   :  { %2533 = vmatprep.subr.bf16.mxu0 %v3080_v34  ;;  %2565 = vmatprep.subr.bf16.mxu1 %v3215_v50 }
 0x49f   :  { %2535 = vmatpush1.bf16.msra.mxu0 %v3083_v41  ;;  %2567 = vmatpush1.bf16.msra.mxu1 %v3220_v58 }
 0x4a0   :  { %2569 = vmatprep.subr.bf16.mxu0 %v3039_v9  ;;  %2601 = vmatprep.subr.bf16.mxu1 %v3156_v54 }
 0x555   :  { %v1259_v59 = vpop.f32.mrb[8].mxu0  ;;  %v1330_v3 = vpop.f32.mrb[24].mxu1 }
 0x556   :  { %v1335_v32 = vadd.f32 %v1259_v59, %v3268_v49  ;;  %v1261_v47 = vpop.f32.mrb[9].mxu0  ;;  %v1332_v37 = vpop.f32.mrb[25].mxu1  ;;  %v2768_v38 = vadd.f32 %v1330_v3, %v3286_v51 }
 0x557   :  { %v1336_v30 = vadd.f32 %v1261_v47, %v3270_v55  ;;  %v2769_v60 = vadd.f32 %v1332_v37, %v3288_v0 }
 0x558   :  { %v2108_v12 = vmul.f32 -1.442695, %v1335_v32 }
 0x559   :  { %v2109_v53 = vmul.f32 -1.442695, %v1336_v30  ;;  %v2110_v40 = vmul.f32 -1.442695, %v2769_v60 }
 0x55a   :  { %2861 = vpow2.f32 %v2108_v12 }
 0x55b   :  { %2863 = vpow2.f32 %v2109_v53 }
 0x55c   :  { %2865 = vpow2.f32 %v2110_v40 }
 0x55d   :  { %2867 = vtanh.f32 %v2768_v38 }
 0x564   :  { %v2862_v46 = vpop.eup %2861 }
 0x565   :  { %v2864_v5 = vpop.eup %2863  ;;  %v1342_v27 = vadd.f32 1.0, %v2862_v46 }
 0x566   :  { %v1348_v28 = vadd.f32 1.0, %v2864_v5  ;;  %v2866_v49 = vpop.eup %2865 }
 0x567   :  { %2869 = vrcp.f32 %v1342_v27  ;;  %v2868_v19 = vpop.eup %2867  ;;  %v1355_v59 = vadd.f32 1.0, %v2866_v49 }
 0x568   :  { %2871 = vrcp.f32 %v1348_v28 }
 0x569   :  { %2873 = vrcp.f32 %v1355_v59 }
 0x571   :  { %v2870_v55 = vpop.eup %2869 }
 0x572   :  { %v2872_v63 = vpop.eup %2871  ;;  %v1359_v36 = vmul.f32 %v2870_v55, %v2868_v19 }
 0x573   :  { %v1358_v32 = vmul.f32 %v2872_v63, %v3430_v18  ;;  %v2874_v3 = vpop.eup %2873 }
 0x575   :  { %v3476_v47 = vadd.f32 %v1359_v36, %v1358_v32 }
 0x577   :  { %2875 = vtanh.f32 %v3476_v47 }
 0x581   :  { %v2876_v37 = vpop.eup %2875 }
 0x582   :  { %v3479_v30 = vmul.f32 %v2876_v37, %v2874_v3 }
 0x584   :  { %1437 = vmatmul.mubr.f32.vlgmr.msra.gmra.mrb[10].mxu0 %v3479_v30  ;;  %1508 = vmatmul.mubr.f32.vlgmr.msra.gmra.mrb[26].mxu1 %v3479_v30 }
 0x585   :  { %2571 = vmatpush1.bf16.msra.mxu0 %v3041_v13  ;;  %2603 = vmatpush1.bf16.msra.mxu1 %v3162_v61 }
 0x586   :  { %2573 = vmatprep.subr.bf16.mxu0 %v3045_v22  ;;  %2605 = vmatprep.subr.bf16.mxu1 %v3165_v62 }
 0x587   :  { %1615 = vmatprep.mubr.f32.mxu0 %v3760_v42  ;;  %1686 = vmatprep.mubr.f32.mxu1 %v3760_v42 }
 0x589   :  { %2575 = vmatpush1.bf16.msra.mxu0 %v3047_v26  ;;  %2607 = vmatpush1.bf16.msra.mxu1 %v3172_v7 }
 0x58a   :  { %2577 = vmatprep.subr.bf16.mxu0 %v3050_v35  ;;  %2609 = vmatprep.subr.bf16.mxu1 %v3175_v8 }
 0x58d   :  { %2579 = vmatpush1.bf16.msra.mxu0 %v3053_v39  ;;  %2611 = vmatpush1.bf16.msra.mxu1 %v3180_v48 }
 0x58e   :  { %2581 = vmatprep.subr.bf16.mxu0 %v3056_v44  ;;  %2613 = vmatprep.subr.bf16.mxu1 %v3183_v17 }
 0x591   :  { %2583 = vmatpush1.bf16.msra.mxu0 %v3059_v52  ;;  %2615 = vmatpush1.bf16.msra.mxu1 %v3188_v56 }
 0x592   :  { %2585 = vmatprep.subr.bf16.mxu0 %v3062_v57  ;;  %2617 = vmatprep.subr.bf16.mxu1 %v3191_v25 }
 0x595   :  { %2587 = vmatpush1.bf16.msra.mxu0 %v3065_v1  ;;  %2619 = vmatpush1.bf16.msra.mxu1 %v3196_v2 }
 0x596   :  { %2589 = vmatprep.subr.bf16.mxu0 %v3068_v6  ;;  %2621 = vmatprep.subr.bf16.mxu1 %v3199_v33 }
 0x599   :  { %2591 = vmatpush1.bf16.msra.mxu0 %v3071_v15  ;;  %2623 = vmatpush1.bf16.msra.mxu1 %v3204_v11 }
 0x59a   :  { %2593 = vmatprep.subr.bf16.mxu0 %v3074_v20  ;;  %2625 = vmatprep.subr.bf16.mxu1 %v3207_v43 }
 0x59d   :  { %2595 = vmatpush1.bf16.msra.mxu0 %v3077_v29  ;;  %2627 = vmatpush1.bf16.msra.mxu1 %v3212_v21 }
 0x59e   :  { %2597 = vmatprep.subr.bf16.mxu0 %v3080_v34  ;;  %2629 = vmatprep.subr.bf16.mxu1 %v3215_v50 }
 0x5a1   :  { %2599 = vmatpush1.bf16.msra.mxu0 %v3083_v41  ;;  %2631 = vmatpush1.bf16.msra.mxu1 %v3220_v58 }
 0x5a2   :  { %2633 = vmatprep.subr.bf16.mxu0 %v3039_v9  ;;  %2665 = vmatprep.subr.bf16.mxu1 %v3156_v54 }
 0x657   :  { %v1438_v18 = vpop.f32.mrb[10].mxu0  ;;  %v1509_v12 = vpop.f32.mrb[26].mxu1 }
 0x658   :  { %v1514_v53 = vadd.f32 %v1438_v18, %v3272_v4  ;;  %v1440_v60 = vpop.f32.mrb[11].mxu0  ;;  %v1511_v40 = vpop.f32.mrb[27].mxu1  ;;  %v2770_v49 = vadd.f32 %v1509_v12, %v3286_v51 }
 0x659   :  { %v1515_v38 = vadd.f32 %v1440_v60, %v3274_v10  ;;  %v2771_v27 = vadd.f32 %v1511_v40, %v3288_v0 }
 0x65a   :  { %v2111_v46 = vmul.f32 -1.442695, %v1514_v53 }
 0x65b   :  { %v2112_v5 = vmul.f32 -1.442695, %v1515_v38  ;;  %v2113_v28 = vmul.f32 -1.442695, %v2771_v27  ;;  %v1914_v38 = vld [vmem:[%s3748_s4 + $0x20] sm:$0xff]  ;;  %v1921_v27 = vld [vmem:[%s3748_s4 + $0x58] sm:$0xff] }
 0x65c   :  { %2877 = vpow2.f32 %v2111_v46  ;;  %v1916_v46 = vld [vmem:[%s3748_s4 + $0x30] sm:$0xff] }
 0x65d   :  { %2879 = vpow2.f32 %v2112_v5  ;;  %v1919_v5 = vld [vmem:[%s3748_s4 + $0x48] sm:$0xff] }
 0x65e   :  { %2881 = vpow2.f32 %v2113_v28  ;;  %v2702_v28 = vpack.c.bf16 %v1916_v46, %v1914_v38  ;;  %v3763_v46 = vld [vmem:[#allocation10_spill] sm:$0xff] }
 0x65f   :  { %2883 = vtanh.f32 %v2770_v49  ;;  %v2704_v49 = vpack.c.bf16 %v1921_v27, %v1919_v5 }
 0x666   :  { %v2878_v9 = vpop.eup %2877 }
 0x667   :  { %v2880_v19 = vpop.eup %2879  ;;  %v1521_v54 = vadd.f32 1.0, %v2878_v9  ;;  %v1918_v9 = vld [vmem:[%s3748_s4 + $0x40] sm:$0xff] }
 0x668   :  { %v1527_v55 = vadd.f32 1.0, %v2880_v19  ;;  %v2882_v4 = vpop.eup %2881  ;;  %v1920_v19 = vld [vmem:[%s3748_s4 + $0x50] sm:$0xff] }
 0x669   :  { %2885 = vrcp.f32 %v1521_v54  ;;  %v2884_v63 = vpop.eup %2883  ;;  %v1534_v32 = vadd.f32 1.0, %v2882_v4  ;;  %v1923_v54 = vld [vmem:[%s3748_s4 + $0x68] sm:$0xff]  ;;  %v2706_v4 = vpack.c.bf16 %v1920_v19, %v1918_v9 }
 0x66a   :  { %2887 = vrcp.f32 %v1527_v55  ;;  %v1925_v55 = vld [vmem:[%s3748_s4 + $0x78] sm:$0xff] }
 0x66b   :  { %2889 = vrcp.f32 %v1534_v32  ;;  %v1929_v32 = vld [vmem:[%s3748_s4 + $0x98] sm:$0xff] }
 0x673   :  { %v2886_v10 = vpop.eup %2885 }
 0x674   :  { %v2888_v36 = vpop.eup %2887  ;;  %v1538_v59 = vmul.f32 %v2886_v10, %v2884_v63  ;;  %v2708_v63 = vpack.c.bf16 %v1925_v55, %v1923_v54  ;;  %v1922_v10 = vld [vmem:[%s3748_s4 + $0x60] sm:$0xff] }
 0x675   :  { %v1537_v3 = vmul.f32 %v2888_v36, %v3476_v47  ;;  %v2890_v18 = vpop.eup %2889  ;;  %v1924_v36 = vld [vmem:[%s3748_s4 + $0x70] sm:$0xff] }
 0x677   :  { %v3522_v37 = vadd.f32 %v1538_v59, %v1537_v3  ;;  %v1927_v59 = vld [vmem:[%s3748_s4 + $0x88] sm:$0xff]  ;;  %v2710_v3 = vpack.c.bf16 %v1924_v36, %v1922_v10 }
 0x679   :  { %2891 = vtanh.f32 %v3522_v37 }
 0x683   :  { %v2892_v12 = vpop.eup %2891 }
 0x684   :  { %v3525_v53 = vmul.f32 %v2892_v12, %v2890_v18  ;;  %v1926_v18 = vld [vmem:[%s3748_s4 + $0x80] sm:$0xff]  ;;  %v1928_v12 = vld [vmem:[%s3748_s4 + $0x90] sm:$0xff] }
 0x686   :  { %1616 = vmatmul.mubr.f32.vlgmr.msra.gmra.mrb[12].mxu0 %v3525_v53  ;;  %1687 = vmatmul.mubr.f32.vlgmr.msra.gmra.mrb[28].mxu1 %v3525_v53 }
 0x687   :  { %2635 = vmatpush1.bf16.msra.mxu0 %v3041_v13  ;;  %2667 = vmatpush1.bf16.msra.mxu1 %v3162_v61  ;;  %v1911_v13 = vld [vmem:[%s3748_s4 + $0x8] sm:$0xff] }
 0x688   :  { %2637 = vmatprep.subr.bf16.mxu0 %v3045_v22  ;;  %2669 = vmatprep.subr.bf16.mxu1 %v3165_v62  ;;  %v1913_v22 = vld [vmem:[%s3748_s4 + $0x18] sm:$0xff] }
 0x689   :  { %1794 = vmatprep.mubr.f32.mxu0 %v3760_v42  ;;  %1865 = vmatprep.mubr.f32.mxu1 %v3760_v42 }
 0x68b   :  { %2639 = vmatpush1.bf16.msra.mxu0 %v3047_v26  ;;  %2671 = vmatpush1.bf16.msra.mxu1 %v3172_v7  ;;  %v2696_v26 = vpack.c.bf16 %v1913_v22, %v1911_v13  ;;  %v1931_v13 = vld [vmem:[%s3748_s4 + $0xa8] sm:$0xff]  ;;  %v1933_v22 = vld [vmem:[%s3748_s4 + $0xb8] sm:$0xff] }
 0x68c   :  { %2641 = vmatprep.subr.bf16.mxu0 %v3050_v35  ;;  %2673 = vmatprep.subr.bf16.mxu1 %v3175_v8 }
 0x68f   :  { %2643 = vmatpush1.bf16.msra.mxu0 %v3053_v39  ;;  %2675 = vmatpush1.bf16.msra.mxu1 %v3180_v48 }
 0x690   :  { %2645 = vmatprep.subr.bf16.mxu0 %v3056_v44  ;;  %2677 = vmatprep.subr.bf16.mxu1 %v3183_v17 }
 0x693   :  { %2647 = vmatpush1.bf16.msra.mxu0 %v3059_v52  ;;  %2679 = vmatpush1.bf16.msra.mxu1 %v3188_v56 }
 0x694   :  { %2649 = vmatprep.subr.bf16.mxu0 %v3062_v57  ;;  %2681 = vmatprep.subr.bf16.mxu1 %v3191_v25 }
 0x697   :  { %2651 = vmatpush1.bf16.msra.mxu0 %v3065_v1  ;;  %2683 = vmatpush1.bf16.msra.mxu1 %v3196_v2 }
 0x698   :  { %2653 = vmatprep.subr.bf16.mxu0 %v3068_v6  ;;  %2685 = vmatprep.subr.bf16.mxu1 %v3199_v33 }
 0x69b   :  { %2655 = vmatpush1.bf16.msra.mxu0 %v3071_v15  ;;  %2687 = vmatpush1.bf16.msra.mxu1 %v3204_v11 }
 0x69c   :  { %2657 = vmatprep.subr.bf16.mxu0 %v3074_v20  ;;  %2689 = vmatprep.subr.bf16.mxu1 %v3207_v43  ;;  %v1910_v43 = vld [vmem:[%s3748_s4] sm:$0xff] }
 0x69f   :  { %2659 = vmatpush1.bf16.msra.mxu0 %v3077_v29  ;;  %2691 = vmatpush1.bf16.msra.mxu1 %v3212_v21  ;;  %v1912_v21 = vld [vmem:[%s3748_s4 + $0x10] sm:$0xff] }
 0x6a0   :  { %2661 = vmatprep.subr.bf16.mxu0 %v3080_v34  ;;  %2693 = vmatprep.subr.bf16.mxu1 %v3215_v50  ;;  %v1915_v50 = vld [vmem:[%s3748_s4 + $0x28] sm:$0xff]  ;;  %v2698_v47 = vpack.c.bf16 %v1912_v21, %v1910_v43 }
 0x6a3   :  { %2663 = vmatpush1.bf16.msra.mxu0 %v3083_v41  ;;  %2695 = vmatpush1.bf16.msra.mxu1 %v3220_v58  ;;  %v1917_v58 = vld [vmem:[%s3748_s4 + $0x38] sm:$0xff] }
 0x6a4   :  { %2697 = vmatprep.subr.bf16.mxu0 %v2696_v26  ;;  %v2700_v40 = vpack.c.bf16 %v1917_v58, %v1915_v50  ;;  %v2714_v26 = vpack.c.bf16 %v1928_v12, %v1926_v18 }
 0x759   :  { %v1617_v35 = vpop.f32.mrb[12].mxu0  ;;  %v1688_v39 = vpop.f32.mrb[28].mxu1 }
 0x75a   :  { %v1693_v44 = vadd.f32 %v1617_v35, %v3276_v14  ;;  %v1619_v52 = vpop.f32.mrb[13].mxu0  ;;  %v1690_v57 = vpop.f32.mrb[29].mxu1  ;;  %v2772_v34 = vadd.f32 %v1688_v39, %v3286_v51  ;;  %v2716_v35 = vpack.c.bf16 %v1933_v22, %v1931_v13  ;;  %v1930_v39 = vld [vmem:[%s3748_s4 + $0xa0] sm:$0xff] }
 0x75b   :  { %v1694_v1 = vadd.f32 %v1619_v52, %v3278_v23  ;;  %v2773_v20 = vadd.f32 %v1690_v57, %v3288_v0  ;;  %v1935_v52 = vld [vmem:[%s3748_s4 + $0xc8] sm:$0xff]  ;;  %v1937_v57 = vld [vmem:[%s3748_s4 + $0xd8] sm:$0xff] }
 0x75c   :  { %v2114_v6 = vmul.f32 -1.442695, %v1693_v44  ;;  %v1932_v44 = vld [vmem:[%s3748_s4 + $0xb0] sm:$0xff] }
 0x75d   :  { %v2115_v15 = vmul.f32 -1.442695, %v1694_v1  ;;  %v2116_v29 = vmul.f32 -1.442695, %v2773_v20  ;;  %v2718_v1 = vpack.c.bf16 %v1932_v44, %v1930_v39  ;;  %v1936_v20 = vld [vmem:[%s3748_s4 + $0xd0] sm:$0xff] }
 0x75e   :  { %2893 = vpow2.f32 %v2114_v6  ;;  %v2720_v6 = vpack.c.bf16 %v1937_v57, %v1935_v52 }
 0x75f   :  { %2895 = vpow2.f32 %v2115_v15  ;;  %v1934_v15 = vld [vmem:[%s3748_s4 + $0xc0] sm:$0xff] }
 0x760   :  { %2897 = vpow2.f32 %v2116_v29  ;;  %v1939_v29 = vld [vmem:[%s3748_s4 + $0xe8] sm:$0xff] }
 0x761   :  { %2899 = vtanh.f32 %v2772_v34  ;;  %v1941_v34 = vld [vmem:[%s3748_s4 + $0xf8] sm:$0xff] }
 0x768   :  { %v2894_v41 = vpop.eup %2893 }
 0x769   :  { %v2896_v61 = vpop.eup %2895  ;;  %v1700_v62 = vadd.f32 1.0, %v2894_v41  ;;  %v2722_v41 = vpack.c.bf16 %v1936_v20, %v1934_v15 }
 0x76a   :  { %v1706_v7 = vadd.f32 1.0, %v2896_v61  ;;  %v2898_v8 = vpop.eup %2897  ;;  %v2724_v61 = vpack.c.bf16 %v1941_v34, %v1939_v29 }
 0x76b   :  { %2901 = vrcp.f32 %v1700_v62  ;;  %v2900_v48 = vpop.eup %2899  ;;  %v1713_v2 = vadd.f32 1.0, %v2898_v8  ;;  %v1938_v62 = vld [vmem:[%s3748_s4 + $0xe0] sm:$0xff] }
 0x76c   :  { %2903 = vrcp.f32 %v1706_v7  ;;  %v1940_v7 = vld [vmem:[%s3748_s4 + $0xf0] sm:$0xff] }
 0x76d   :  { %2905 = vrcp.f32 %v1713_v2  ;;  %v2726_v8 = vpack.c.bf16 %v1940_v7, %v1938_v62 }
 0x775   :  { %v2902_v17 = vpop.eup %2901 }
 0x776   :  { %v2904_v56 = vpop.eup %2903  ;;  %v1717_v25 = vmul.f32 %v2902_v17, %v2900_v48 }
 0x777   :  { %v1716_v33 = vmul.f32 %v2904_v56, %v3522_v37  ;;  %v2906_v14 = vpop.eup %2905  ;;  %v2712_v37 = vpack.c.bf16 %v1929_v32, %v1927_v59  ;;  %v3762_v56 = vld [vmem:[#allocation12_spill] sm:$0xff] }
 0x779   :  { %v3572_v11 = vadd.f32 %v1717_v25, %v1716_v33 }
 0x77b   :  { %2907 = vtanh.f32 %v3572_v11 }
 0x785   :  { %v2908_v23 = vpop.eup %2907 }
 0x786   :  { %v3587_v60 = vmul.f32 %v2908_v23, %v2906_v14  ;;  %v1942_v23 = vld [vmem:[%s3749_s5] sm:$0x3] }
 0x788   :  { %1795 = vmatmul.mubr.f32.vlgmr.msra.gmra.mrb[14].mxu0 %v3587_v60  ;;  %1866 = vmatmul.mubr.f32.vlgmr.msra.gmra.mrb[30].mxu1 %v3587_v60 }
 0x789   :  { %2699 = vmatpush1.bf16.msra.mxu0 %v2698_v47  ;;  %2018 = vmatprep.mubr.f32.mxu0 %v3760_v42 }
 0x78a   :  { %2701 = vmatprep.subr.bf16.mxu0 %v2700_v40 }
 0x78d   :  { %2703 = vmatpush1.bf16.msra.mxu0 %v2702_v28  ;;  %v3765_v28 = vsub.s32 1, %v3763_v46 }
 0x78e   :  { %2705 = vmatprep.subr.bf16.mxu0 %v2704_v49 }
 0x78f   :  { %v1951_v49 = vrot.slane %v1942_v23, %v3765_v28 }
 0x791   :  { %2707 = vmatpush1.bf16.msra.mxu0 %v2706_v4 }
 0x792   :  { %2709 = vmatprep.subr.bf16.mxu0 %v2708_v63 }
 0x795   :  { %2711 = vmatpush1.bf16.msra.mxu0 %v2710_v3 }
 0x796   :  { %2713 = vmatprep.subr.bf16.mxu0 %v2712_v37 }
 0x799   :  { %2715 = vmatpush1.bf16.msra.mxu0 %v2714_v26 }
 0x79a   :  { %2717 = vmatprep.subr.bf16.mxu0 %v2716_v35 }
 0x79d   :  { %2719 = vmatpush1.bf16.msra.mxu0 %v2718_v1 }
 0x79e   :  { %2721 = vmatprep.subr.bf16.mxu0 %v2720_v6 }
 0x7a1   :  { %2723 = vmatpush1.bf16.msra.mxu0 %v2722_v41 }
 0x7a2   :  { %2725 = vmatprep.subr.bf16.mxu0 %v2724_v61 }
 0x7a5   :  { %2727 = vmatpush1.bf16.msra.mxu0 %v2726_v8 }
 0x7a8   :  { %2019 = vmatmul.mubr.f32.vlgmr.msra.gmra.mrb[16].mxu0 %v3295_v16 }
 0x7a9   :  { %2024 = vmatprep.mubr.f32.mxu0 %v3760_v42 }
 0x7ac   :  { %2025 = vmatmul.mubr.f32.gmra.mrb[18].mxu0 %v3341_v31 }
 0x7ad   :  { %2030 = vmatprep.mubr.f32.mxu0 %v3760_v42 }
 0x7b0   :  { %2031 = vmatmul.mubr.f32.gmra.mrb[20].mxu0 %v3387_v24  ;;  %v3761_v24 = vld [vmem:[#allocation11_spill] sm:$0xff] }
 0x7b1   :  { %2036 = vmatprep.mubr.f32.mxu0 %v3760_v42 }
 0x7b4   :  { %2037 = vmatmul.mubr.f32.gmra.mrb[22].mxu0 %v3433_v45 }
 0x7b5   :  { %2042 = vmatprep.mubr.f32.mxu0 %v3760_v42 }
 0x7b8   :  { %2043 = vmatmul.mubr.f32.gmra.mrb[24].mxu0 %v3479_v30 }
 0x7b9   :  { %2048 = vmatprep.mubr.f32.mxu0 %v3760_v42 }
 0x7bc   :  { %2049 = vmatmul.mubr.f32.gmra.mrb[26].mxu0 %v3525_v53 }
 0x7bd   :  { %2054 = vmatprep.mubr.f32.mxu0 %v3760_v42 }
 0x7c0   :  { %2055 = vmatmul.mubr.f32.gmra.mrb[28].mxu0 %v3587_v60 }
 0x7c1   :  { %2060 = vmatprep.mubr.f32.mxu0 %v3760_v42 }
 0x85b   :  { %v1796_v16 = vpop.f32.mrb[14].mxu0  ;;  %v1867_v31 = vpop.f32.mrb[30].mxu1 }
 0x85c   :  { %v1872_v48 = vadd.f32 %v1796_v16, %v3761_v24  ;;  %v1798_v17 = vpop.f32.mrb[15].mxu0  ;;  %v1869_v45 = vpop.f32.mrb[31].mxu1  ;;  %v2774_v43 = vadd.f32 %v1867_v31, %v3286_v51  ;;  %v3764_v51 = vsub.s32 0, %v3763_v46 }
 0x85d   :  { %v1873_v25 = vadd.f32 %v1798_v17, %v3762_v56  ;;  %v2775_v53 = vadd.f32 %v1869_v45, %v3288_v0 }
 0x85e   :  { %v2117_v2 = vmul.f32 -1.442695, %v1872_v48  ;;  %v1947_v5 = vrot.slane %v1942_v23, %v3764_v51 }
 0x85f   :  { %v2118_v30 = vmul.f32 -1.442695, %v1873_v25  ;;  %v2119_v33 = vmul.f32 -1.442695, %v2775_v53 }
 0x860   :  { %2909 = vpow2.f32 %v2117_v2 }
 0x861   :  { %2911 = vpow2.f32 %v2118_v30 }
 0x862   :  { %2913 = vpow2.f32 %v2119_v33 }
 0x863   :  { %2915 = vtanh.f32 %v2774_v43 }
 0x86a   :  { %v2910_v21 = vpop.eup %2909 }
 0x86b   :  { %v2912_v50 = vpop.eup %2911  ;;  %v1879_v42 = vadd.f32 1.0, %v2910_v21 }
 0x86c   :  { %v1885_v58 = vadd.f32 1.0, %v2912_v50  ;;  %v2914_v14 = vpop.eup %2913 }
 0x86d   :  { %2917 = vrcp.f32 %v1879_v42  ;;  %v2916_v47 = vpop.eup %2915  ;;  %v1892_v38 = vadd.f32 1.0, %v2914_v14 }
 0x86e   :  { %2919 = vrcp.f32 %v1885_v58 }
 0x86f   :  { %2921 = vrcp.f32 %v1892_v38 }
 0x877   :  { %v2918_v60 = vpop.eup %2917 }
 0x878   :  { %v2920_v40 = vpop.eup %2919  ;;  %v1896_v0 = vmul.f32 %v2918_v60, %v2916_v47 }
 0x879   :  { %v1895_v27 = vmul.f32 %v2920_v40, %v3572_v11  ;;  %v2922_v18 = vpop.eup %2921 }
 0x87b   :  { %v2020_v9 = vpop.f32.mrb[16].mxu0  ;;  %v1897_v19 = vadd.f32 %v1896_v0, %v1895_v27 }
 0x87c   :  { %v2021_v54 = vadd.f32 %v2020_v9, %v1947_v5  ;;  %v2022_v55 = vpop.f32.mrb[17].mxu0 }
 0x87d   :  { %v2023_v4 = vadd.f32 %v2022_v55, %v1951_v49  ;;  %2923 = vtanh.f32 %v1897_v19 }
 0x87e   :  { %2067 = vst [vmem:[%s3750_s6] sm:$0xff] %v2021_v54 }
 0x87f   :  { %2068 = vst [vmem:[%s3750_s6 + $0x8] sm:$0xff] %v2023_v4  ;;  %v2026_v63 = vpop.f32.mrb[18].mxu0 }
 0x880   :  { %v2027_v11 = vadd.f32 %v2026_v63, %v1947_v5  ;;  %v2028_v10 = vpop.f32.mrb[19].mxu0 }
 0x881   :  { %v2029_v36 = vadd.f32 %v2028_v10, %v1951_v49 }
 0x882   :  { %2069 = vst [vmem:[%s3750_s6 + $0x10] sm:$0xff] %v2027_v11 }
 0x883   :  { %2070 = vst [vmem:[%s3750_s6 + $0x18] sm:$0xff] %v2029_v36  ;;  %v2032_v59 = vpop.f32.mrb[20].mxu0 }
 0x884   :  { %v2033_v32 = vadd.f32 %v2032_v59, %v1947_v5  ;;  %v2034_v3 = vpop.f32.mrb[21].mxu0 }
 0x885   :  { %v2035_v37 = vadd.f32 %v2034_v3, %v1951_v49 }
 0x886   :  { %2071 = vst [vmem:[%s3750_s6 + $0x20] sm:$0xff] %v2033_v32 }
 0x887   :  { %v2924_v12 = vpop.eup %2923  ;;  %2072 = vst [vmem:[%s3750_s6 + $0x28] sm:$0xff] %v2035_v37  ;;  %v2038_v13 = vpop.f32.mrb[22].mxu0 }
 0x888   :  { %v2039_v22 = vadd.f32 %v2038_v13, %v1947_v5  ;;  %v2040_v26 = vpop.f32.mrb[23].mxu0  ;;  %v1899_v35 = vmul.f32 %v2924_v12, %v2922_v18 }
 0x889   :  { %v2041_v39 = vadd.f32 %v2040_v26, %v1951_v49 }
 0x88a   :  { %2073 = vst [vmem:[%s3750_s6 + $0x30] sm:$0xff] %v2039_v22  ;;  %2061 = vmatmul.mubr.f32.gmra.mrb[30].mxu0 %v1899_v35 }
 0x88b   :  { %2074 = vst [vmem:[%s3750_s6 + $0x38] sm:$0xff] %v2041_v39  ;;  %v2044_v44 = vpop.f32.mrb[24].mxu0 }
 0x88c   :  { %v2045_v52 = vadd.f32 %v2044_v44, %v1947_v5  ;;  %v2046_v57 = vpop.f32.mrb[25].mxu0 }
 0x88d   :  { %v2047_v1 = vadd.f32 %v2046_v57, %v1951_v49 }
 0x88e   :  { %2075 = vst [vmem:[%s3750_s6 + $0x40] sm:$0xff] %v2045_v52 }
 0x88f   :  { %2076 = vst [vmem:[%s3750_s6 + $0x48] sm:$0xff] %v2047_v1  ;;  %v2050_v6 = vpop.f32.mrb[26].mxu0 }
 0x890   :  { %v2051_v15 = vadd.f32 %v2050_v6, %v1947_v5  ;;  %v2052_v20 = vpop.f32.mrb[27].mxu0 }
 0x891   :  { %v2053_v29 = vadd.f32 %v2052_v20, %v1951_v49 }
 0x892   :  { %2077 = vst [vmem:[%s3750_s6 + $0x50] sm:$0xff] %v2051_v15 }
 0x893   :  { %2078 = vst [vmem:[%s3750_s6 + $0x58] sm:$0xff] %v2053_v29  ;;  %v2056_v34 = vpop.f32.mrb[28].mxu0 }
 0x894   :  { %v2057_v41 = vadd.f32 %v2056_v34, %v1947_v5  ;;  %v2058_v61 = vpop.f32.mrb[29].mxu0 }
 0x895   :  { %v2059_v62 = vadd.f32 %v2058_v61, %v1951_v49 }
 0x896   :  { %2079 = vst [vmem:[%s3750_s6 + $0x60] sm:$0xff] %v2057_v41 }
 0x897   :  { %2080 = vst [vmem:[%s3750_s6 + $0x68] sm:$0xff] %v2059_v62 }
 0x95d   :  { %v2062_v7 = vpop.f32.mrb[30].mxu0 }
 0x95e   :  { %v2063_v8 = vadd.f32 %v2062_v7, %v1947_v5  ;;  %v2064_v16 = vpop.f32.mrb[31].mxu0 }
 0x95f   :  { %v2065_v31 = vadd.f32 %v2064_v16, %v1951_v49 }
 0x960   :  { %2081 = vst [vmem:[%s3750_s6 + $0x70] sm:$0xff] %v2063_v8 }
 0x961   :  { %2082 = vst [vmem:[%s3750_s6 + $0x78] sm:$0xff] %v2065_v31 }
 0x962   :  { %2087 = vsyncpa [#allocation5], 1 }
 0x963   :  { %2088 = vsyncpa [#allocation7], 1 }

</bundles_post_ra>
